<compile_context>
chip_gen: v7x
topology: tpu7x:2x2x1
jax: 0.10.0
libtpu: 0.0.40
codegen_flags: <defaults>
</compile_context>

<pallas_src>
import functools

import jax
import jax.numpy as jnp
from jax.experimental import pallas as pl
from jax.experimental.pallas import tpu as pltpu


def _pool_fc_kernel(x_ref, w_ref, b_ref, o_ref, *, inv_spatial):
    """Fused global-average-pool + fc, single grid step.

    x_ref: (B, S, C) f32  channels-last feature map (C on lanes)
    w_ref: (C, NC)   f32  fc weight (x @ W layout, i.e. torch W.T)
    b_ref: (1, NC)   f32  fc bias
    o_ref: (B, NC)   f32  regression output
    """
    # Global pool: sublane reduce over the spatial axis; keep the sum and fold
    # the 1/S scale in after the matmul (mean(x) @ W == (sum(x) @ W) / S).
    pooled = jnp.sum(x_ref[...], axis=1)                      # (B, C) f32
    out = jnp.dot(pooled, w_ref[...],
                  preferred_element_type=jnp.float32)         # (B, NC) f32, MXU
    o_ref[...] = out * inv_spatial + b_ref[...]


@jax.jit
def regression_net_head_forward(features_nchw, w_fc, b_fc):
    """Fused (adaptive-avg-pool -> flatten -> Linear) head of RegressionNet.

    features_nchw: (B, C, H, W) f32 ResNet-50 backbone feature map (NCHW, as
                   the torch module would hand it over).
    w_fc:          (C, 8) f32 fc weight (stored as x @ W, i.e. torch W.T).
    b_fc:          (8,)   f32 fc bias.
    Returns (B, 8) f32 regression outputs.
    """
    B, C, H, W = features_nchw.shape
    S = H * W
    NC = w_fc.shape[1]

    # Channels-last for the kernel: C (2048) sits on the lane axis, S on
    # sublanes. A backbone emitting NHWC could skip this transpose entirely.
    x = jnp.transpose(features_nchw, (0, 2, 3, 1)).reshape(B, S, C)

    b2 = b_fc.reshape(1, NC).astype(jnp.float32)

    # Single grid step: everything fits comfortably in VMEM on v5e/v6e/v7x
    # (~1 MiB padded activation + ~1 MiB lane-padded weight, well under even
    # v7x's 32 MiB default scoped limit). If B or C ever grow large, reintroduce
    # a K-tiled reduction grid with TK >= 1024 instead of shrinking this block.
    return pl.pallas_call(
        functools.partial(_pool_fc_kernel, inv_spatial=1.0 / float(S)),
        out_shape=jax.ShapeDtypeStruct((B, NC), jnp.float32),
        grid=(1,),
        in_specs=[
            # Full-array blocks (legal regardless of the (8,128) rule).
            pl.BlockSpec((B, S, C), lambda i: (0, 0, 0)),
            pl.BlockSpec((C, NC), lambda i: (0, 0)),
            pl.BlockSpec((1, NC), lambda i: (0, 0)),
        ],
        out_specs=pl.BlockSpec((B, NC), lambda i: (0, 0)),
        compiler_params=pltpu.CompilerParams(
            dimension_semantics=("arbitrary",),
        ),
    )(x, w_fc.astype(jnp.float32), b2)


def _init_linear(key, fan_in, fan_out):
    """PyTorch-style Linear init: U(-1/sqrt(fan_in), 1/sqrt(fan_in))."""
    kw, kb = jax.random.split(key)
    bound = 1.0 / jnp.sqrt(jnp.float32(fan_in))
    # Stored as (fan_in, fan_out) so the kernel computes x @ W (== x @ W_torch.T).
    w = jax.random.uniform(kw, (fan_in, fan_out), jnp.float32, -bound, bound)
    b = jax.random.uniform(kb, (fan_out,), jnp.float32, -bound, bound)
    return w, b


if __name__ == "__main__":
    # ResNet-50 tail shapes: fc.in_features = 2048 channels, 7x7 feature map
    # (what a 224x224 input produces), replaced fc -> 8 regression outputs.
    B = 2
    C = 2048
    Hs = Ws = 7
    NUM_OUTPUTS = 8

    root = jax.random.PRNGKey(0)
    kx, kfc = jax.random.split(root, 2)

    # Stand-in for the (untranslated) ResNet-50 backbone feature map.
    features = jax.random.normal(kx, (B, C, Hs, Ws), jnp.float32)
    w_fc, b_fc = _init_linear(kfc, C, NUM_OUTPUTS)

    out = regression_net_head_forward(features, w_fc, b_fc)
    out = jax.block_until_ready(out)

    # Plain-JAX f32 reference (kernel is f32 end-to-end now).
    pooled_ref = jnp.mean(features.reshape(B, C, Hs * Ws), axis=-1)
    ref = jnp.dot(pooled_ref, w_fc, preferred_element_type=jnp.float32) + b_fc

    assert out.shape == (B, NUM_OUTPUTS)
    assert jnp.allclose(out, ref, atol=1e-3, rtol=1e-3), float(
        jnp.max(jnp.abs(out - ref))
    )

    print("KERNEL_OK")
</pallas_src>

<mosaic_0001>
module attributes {stable_mosaic.version = 11 : i64} {
  func.func @_pool_fc_kernel(%arg0: i32, %arg1: memref<2x49x2048xf32, #tpu.memory_space<vmem>>, %arg2: memref<2048x8xf32, #tpu.memory_space<vmem>>, %arg3: memref<1x8xf32, #tpu.memory_space<vmem>>, %arg4: memref<2x8xf32, #tpu.memory_space<vmem>>) attributes {dimension_semantics = [#tpu.dimension_semantics<arbitrary>], iteration_bounds = array<i64: 1>, scalar_prefetch = 0 : i64, scratch_operands = 0 : i64, tpu.core_type = #tpu.core_type<tc>, window_params = [{pipeline_mode = #tpu.pipeline_mode<synchronous>, transform_indices = @transform_0, window_bounds = array<i64: 2, 49, 2048>}, {pipeline_mode = #tpu.pipeline_mode<synchronous>, transform_indices = @transform_1, window_bounds = array<i64: 2048, 8>}, {pipeline_mode = #tpu.pipeline_mode<synchronous>, transform_indices = @transform_2, window_bounds = array<i64: 1, 8>}, {pipeline_mode = #tpu.pipeline_mode<synchronous>, transform_indices = @transform_3, window_bounds = array<i64: 2, 8>}]} {
    %c0 = arith.constant 0 : index
    %c0_0 = arith.constant 0 : index
    %c0_1 = arith.constant 0 : index
    %0 = vector.load %arg1[%c0, %c0_0, %c0_1] : memref<2x49x2048xf32, #tpu.memory_space<vmem>>, vector<2x49x2048xf32>
    %cst = arith.constant dense<0.000000e+00> : vector<2x2048xf32>
    %1 = vector.multi_reduction <add>, %0, %cst [1] : vector<2x49x2048xf32> to vector<2x2048xf32>
    %c0_2 = arith.constant 0 : index
    %c0_3 = arith.constant 0 : index
    %2 = vector.load %arg2[%c0_2, %c0_3] : memref<2048x8xf32, #tpu.memory_space<vmem>>, vector<2048x8xf32>
    %cst_4 = arith.constant dense<0.000000e+00> : vector<2x8xf32>
    %3 = tpu.matmul %1, %2, %cst_4 {dimension_numbers = #tpu.dot_dimension_numbers<[1], [0], [0], [1], [0, 0, 1, 1], [], []>} : vector<2x2048xf32>, vector<2048x8xf32>, vector<2x8xf32> -> vector<2x8xf32>
    %cst_5 = arith.constant 0.0204081628 : f32
    %4 = vector.broadcast %cst_5 : f32 to vector<2x8xf32>
    %5 = arith.mulf %3, %4 : vector<2x8xf32>
    %c0_6 = arith.constant 0 : index
    %c0_7 = arith.constant 0 : index
    %6 = vector.load %arg3[%c0_6, %c0_7] : memref<1x8xf32, #tpu.memory_space<vmem>>, vector<1x8xf32>
    %7 = vector.broadcast %6 : vector<1x8xf32> to vector<2x8xf32>
    %8 = arith.addf %5, %7 : vector<2x8xf32>
    %c0_8 = arith.constant 0 : index
    %c0_9 = arith.constant 0 : index
    %9 = vector.load %arg4[%c0_8, %c0_9] : memref<2x8xf32, #tpu.memory_space<vmem>>, vector<2x8xf32>
    tpu.vector_store %arg4[%c0_8, %c0_9], %8 {strides = array<i32>} : memref<2x8xf32, #tpu.memory_space<vmem>>, vector<2x8xf32>,
    return
  }
  func.func @transform_0(%arg0: i32) -> (i32, i32, i32) {
    %c0_i32 = arith.constant 0 : i32
    %c0_i32_0 = arith.constant 0 : i32
    %c0_i32_1 = arith.constant 0 : i32
    %c0_i32_2 = arith.constant 0 : i32
    return %c0_i32, %c0_i32_0, %c0_i32_1 : i32, i32, i32
  }
  func.func @transform_1(%arg0: i32) -> (i32, i32) {
    %c0_i32 = arith.constant 0 : i32
    %c0_i32_0 = arith.constant 0 : i32
    %c0_i32_1 = arith.constant 0 : i32
    return %c0_i32, %c0_i32_0 : i32, i32
  }
  func.func @transform_2(%arg0: i32) -> (i32, i32) {
    %c0_i32 = arith.constant 0 : i32
    %c0_i32_0 = arith.constant 0 : i32
    %c0_i32_1 = arith.constant 0 : i32
    return %c0_i32, %c0_i32_0 : i32, i32
  }
  func.func @transform_3(%arg0: i32) -> (i32, i32) {
    %c0_i32 = arith.constant 0 : i32
    %c0_i32_0 = arith.constant 0 : i32
    %c0_i32_1 = arith.constant 0 : i32
    return %c0_i32, %c0_i32_0 : i32, i32
  }
}

</mosaic_0001>

<bundles_post_ra>
// kernel: regression_net_head_forward.1
= control target key start
LH: loop header
LB: loop body
LE: loop exit
PB: predicated region body
PF: predicated region fallthrough
CT: control target
= control target key end

     0   :  { %vm244_vm0 = vcmask 1040384   ;;  %vm944_vm1 = vcmask 1041409   ;;  %s4275_s0 = inlined_call_operand.vmem [shape: f32[2,49,2048], index: 0, kind: input, shape index: {}]   ;;  %s4276_s1 = inlined_call_operand.vmem [shape: f32[2048,8], index: 1, kind: input, shape index: {}]   ;;  %s4277_s2 = inlined_call_operand.vmem [shape: f32[1,8], index: 2, kind: input, shape index: {}]   ;;  %s4278_s3 = inlined_call_operand.hbm [shape: f32[2,8], index: 3, kind: output, shape index: {}]  }
   0x1   :  { %v672_v0 = vld [vmem:[%s4276_s1 + $0x80] sm:$0xff]  ;;  %v673_v1 = vld [vmem:[%s4276_s1 + $0x88] sm:$0xff]  ;;  %v674_v11 = vld [vmem:[%s4276_s1 + $0x90] sm:$0xff] }
   0x2   :  { %v704_v2 = vld [vmem:[%s4276_s1 + $0x180] sm:$0xff]  ;;  %v1843_v3 = vpack.c.bf16 %v673_v1, %v672_v0  ;;  %v705_v4 = vld [vmem:[%s4276_s1 + $0x188] sm:$0xff]  ;;  %v675_v13 = vld [vmem:[%s4276_s1 + $0x98] sm:$0xff] }
   0x3   :  { %v656_v5 = vld [vmem:[%s4276_s1] sm:$0xff]  ;;  %v657_v6 = vld [vmem:[%s4276_s1 + $0x8] sm:$0xff]  ;;  %v1875_v7 = vpack.c.bf16 %v705_v4, %v704_v2  ;;  %v706_v14 = vld [vmem:[%s4276_s1 + $0x190] sm:$0xff]  ;;  %v1847_v16 = vpack.c.bf16 %v675_v13, %v674_v11 }
   0x4   :  { %v1845_v8 = vpack.c.bf16 %v657_v6, %v656_v5  ;;  %v688_v9 = vld [vmem:[%s4276_s1 + $0x100] sm:$0xff]  ;;  %v689_v10 = vld [vmem:[%s4276_s1 + $0x108] sm:$0xff]  ;;  %1844 = vmatprep.subr.bf16.mxu0 %v1843_v3  ;;  %v707_v15 = vld [vmem:[%s4276_s1 + $0x198] sm:$0xff] }
   0x5   :  { %v1877_v12 = vpack.c.bf16 %v689_v10, %v688_v9  ;;  %1876 = vmatprep.subr.bf16.mxu1 %v1875_v7  ;;  %v1879_v17 = vpack.c.bf16 %v707_v15, %v706_v14  ;;  %v658_v18 = vld [vmem:[%s4276_s1 + $0x10] sm:$0xff]  ;;  %v659_v19 = vld [vmem:[%s4276_s1 + $0x18] sm:$0xff]  ;;  %v676_v23 = vld [vmem:[%s4276_s1 + $0xa0] sm:$0xff] }
   0x6   :  { %1846 = vmatpush3.bf16.msra.mxu0 %v1845_v8  ;;  %v690_v20 = vld [vmem:[%s4276_s1 + $0x110] sm:$0xff]  ;;  %v1849_v21 = vpack.c.bf16 %v659_v19, %v658_v18  ;;  %v691_v22 = vld [vmem:[%s4276_s1 + $0x118] sm:$0xff]  ;;  %v677_v24 = vld [vmem:[%s4276_s1 + $0xa8] sm:$0xff] }
   0x7   :  { %1878 = vmatpush3.bf16.msra.mxu1 %v1877_v12  ;;  %1848 = vmatprep.subr.bf16.mxu0 %v1847_v16  ;;  %v1881_v25 = vpack.c.bf16 %v691_v22, %v690_v20  ;;  %v1851_v26 = vpack.c.bf16 %v677_v24, %v676_v23  ;;  %v708_v27 = vld [vmem:[%s4276_s1 + $0x1a0] sm:$0xff]  ;;  %v709_v28 = vld [vmem:[%s4276_s1 + $0x1a8] sm:$0xff]  ;;  %v678_v35 = vld [vmem:[%s4276_s1 + $0xb0] sm:$0xff] }
   0x8   :  { %1880 = vmatprep.subr.bf16.mxu1 %v1879_v17  ;;  %v660_v29 = vld [vmem:[%s4276_s1 + $0x20] sm:$0xff]  ;;  %v1883_v30 = vpack.c.bf16 %v709_v28, %v708_v27  ;;  %v661_v31 = vld [vmem:[%s4276_s1 + $0x28] sm:$0xff]  ;;  %v679_v36 = vld [vmem:[%s4276_s1 + $0xb8] sm:$0xff] }
   0x9   :  { %v692_v32 = vld [vmem:[%s4276_s1 + $0x120] sm:$0xff]  ;;  %v693_v33 = vld [vmem:[%s4276_s1 + $0x128] sm:$0xff]  ;;  %v1853_v34 = vpack.c.bf16 %v661_v31, %v660_v29  ;;  %v710_v37 = vld [vmem:[%s4276_s1 + $0x1b0] sm:$0xff]  ;;  %v1855_v39 = vpack.c.bf16 %v679_v36, %v678_v35 }
   0xa   :  { %1850 = vmatpush3.bf16.msra.mxu0 %v1849_v21  ;;  %v1885_v38 = vpack.c.bf16 %v693_v33, %v692_v32  ;;  %v711_v40 = vld [vmem:[%s4276_s1 + $0x1b8] sm:$0xff]  ;;  %v662_v41 = vld [vmem:[%s4276_s1 + $0x30] sm:$0xff]  ;;  %v680_v46 = vld [vmem:[%s4276_s1 + $0xc0] sm:$0xff] }
   0xb   :  { %1882 = vmatpush3.bf16.msra.mxu1 %v1881_v25  ;;  %1852 = vmatprep.subr.bf16.mxu0 %v1851_v26  ;;  %v663_v42 = vld [vmem:[%s4276_s1 + $0x38] sm:$0xff]  ;;  %v1887_v43 = vpack.c.bf16 %v711_v40, %v710_v37  ;;  %v694_v44 = vld [vmem:[%s4276_s1 + $0x130] sm:$0xff]  ;;  %v681_v47 = vld [vmem:[%s4276_s1 + $0xc8] sm:$0xff] }
   0xc   :  { %1884 = vmatprep.subr.bf16.mxu1 %v1883_v30  ;;  %v695_v45 = vld [vmem:[%s4276_s1 + $0x138] sm:$0xff]  ;;  %v712_v48 = vld [vmem:[%s4276_s1 + $0x1c0] sm:$0xff]  ;;  %v713_v49 = vld [vmem:[%s4276_s1 + $0x1c8] sm:$0xff]  ;;  %v1857_v50 = vpack.c.bf16 %v663_v42, %v662_v41  ;;  %v1859_v52 = vpack.c.bf16 %v681_v47, %v680_v46 }
   0xd   :  { %v1889_v51 = vpack.c.bf16 %v695_v45, %v694_v44  ;;  %v664_v53 = vld [vmem:[%s4276_s1 + $0x40] sm:$0xff]  ;;  %v665_v54 = vld [vmem:[%s4276_s1 + $0x48] sm:$0xff]  ;;  %v1891_v56 = vpack.c.bf16 %v713_v49, %v712_v48  ;;  %v682_v58 = vld [vmem:[%s4276_s1 + $0xd0] sm:$0xff] }
   0xe   :  { %1854 = vmatpush3.bf16.msra.mxu0 %v1853_v34  ;;  %v696_v55 = vld [vmem:[%s4276_s1 + $0x140] sm:$0xff]  ;;  %v697_v57 = vld [vmem:[%s4276_s1 + $0x148] sm:$0xff]  ;;  %v683_v59 = vld [vmem:[%s4276_s1 + $0xd8] sm:$0xff]  ;;  %v1861_v62 = vpack.c.bf16 %v665_v54, %v664_v53 }
   0xf   :  { %1886 = vmatpush3.bf16.msra.mxu1 %v1885_v38  ;;  %1856 = vmatprep.subr.bf16.mxu0 %v1855_v39  ;;  %v714_v60 = vld [vmem:[%s4276_s1 + $0x1d0] sm:$0xff]  ;;  %v715_v61 = vld [vmem:[%s4276_s1 + $0x1d8] sm:$0xff]  ;;  %v1893_v0 = vpack.c.bf16 %v697_v57, %v696_v55  ;;  %v1863_v1 = vpack.c.bf16 %v683_v59, %v682_v58  ;;  %v684_v6 = vld [vmem:[%s4276_s1 + $0xe0] sm:$0xff] }
  0x10   :  { %1888 = vmatprep.subr.bf16.mxu1 %v1887_v43  ;;  %v666_v63 = vld [vmem:[%s4276_s1 + $0x50] sm:$0xff]  ;;  %v667_v2 = vld [vmem:[%s4276_s1 + $0x58] sm:$0xff]  ;;  %v1895_v5 = vpack.c.bf16 %v715_v61, %v714_v60  ;;  %v685_v7 = vld [vmem:[%s4276_s1 + $0xe8] sm:$0xff] }
  0x11   :  { %v698_v3 = vld [vmem:[%s4276_s1 + $0x150] sm:$0xff]  ;;  %v699_v4 = vld [vmem:[%s4276_s1 + $0x158] sm:$0xff]  ;;  %v716_v8 = vld [vmem:[%s4276_s1 + $0x1e0] sm:$0xff]  ;;  %v1865_v12 = vpack.c.bf16 %v667_v2, %v666_v63  ;;  %v1867_v17 = vpack.c.bf16 %v685_v7, %v684_v6 }
  0x12   :  { %1858 = vmatpush3.bf16.msra.mxu0 %v1857_v50  ;;  %v717_v9 = vld [vmem:[%s4276_s1 + $0x1e8] sm:$0xff]  ;;  %v668_v10 = vld [vmem:[%s4276_s1 + $0x60] sm:$0xff]  ;;  %v686_v15 = vld [vmem:[%s4276_s1 + $0xf0] sm:$0xff]  ;;  %v1897_v16 = vpack.c.bf16 %v699_v4, %v698_v3 }
  0x13   :  { %1890 = vmatpush3.bf16.msra.mxu1 %v1889_v51  ;;  %1860 = vmatprep.subr.bf16.mxu0 %v1859_v52  ;;  %v669_v11 = vld [vmem:[%s4276_s1 + $0x68] sm:$0xff]  ;;  %v700_v13 = vld [vmem:[%s4276_s1 + $0x160] sm:$0xff]  ;;  %v687_v18 = vld [vmem:[%s4276_s1 + $0xf8] sm:$0xff]  ;;  %v1899_v21 = vpack.c.bf16 %v717_v9, %v716_v8 }
  0x14   :  { %1892 = vmatprep.subr.bf16.mxu1 %v1891_v56  ;;  %v701_v14 = vld [vmem:[%s4276_s1 + $0x168] sm:$0xff]  ;;  %v718_v22 = vld [vmem:[%s4276_s1 + $0x1f0] sm:$0xff]  ;;  %v719_v23 = vld [vmem:[%s4276_s1 + $0x1f8] sm:$0xff]  ;;  %v1869_v31 = vpack.c.bf16 %v669_v11, %v668_v10  ;;  %v1871_v37 = vpack.c.bf16 %v687_v18, %v686_v15 }
  0x15   :  { %v16_v19 = vld [vmem:[%s4275_s0 + $0x8] sm:$0xff]  ;;  %v670_v26 = vld [vmem:[%s4276_s1 + $0x70] sm:$0xff]  ;;  %v671_v27 = vld [vmem:[%s4276_s1 + $0x78] sm:$0xff]  ;;  %v1901_v36 = vpack.c.bf16 %v701_v14, %v700_v13  ;;  %v1903_v42 = vpack.c.bf16 %v719_v23, %v718_v22 }
  0x16   :  { %1862 = vmatpush3.bf16.msra.mxu0 %v1861_v62  ;;  %v32_v20 = vld [vmem:[%s4275_s0 + $0x88] sm:$0xff]  ;;  %v2343_v28 = vld [vmem:[%s4276_s1 + $0x170] sm:$0xff]  ;;  %v703_v32 = vld [vmem:[%s4276_s1 + $0x178] sm:$0xff]  ;;  %v1873_v51 = vpack.c.bf16 %v671_v27, %v670_v26 }
  0x17   :  { %1894 = vmatpush3.bf16.msra.mxu1 %v1893_v0  ;;  %1864 = vmatprep.subr.bf16.mxu0 %v1863_v1  ;;  %v48_v24 = vld [vmem:[%s4275_s0 + $0x108] sm:$0xff]  ;;  %v253_v25 = vadd.f32 %v32_v20, %v16_v19  ;;  %v18_v44 = vld [vmem:[%s4275_s0 + $0x18] sm:$0xff]  ;;  %v1905_v52 = vpack.c.bf16 %v703_v32, %v2343_v28  ;;  %v31_v10 = vld [vmem:[%s4275_s0 + $0x80] sm:$0xff] }
  0x18   :  { %1896 = vmatprep.subr.bf16.mxu1 %v1895_v5  ;;  %v64_v29 = vld [vmem:[%s4275_s0 + $0x188] sm:$0xff]  ;;  %v34_v45 = vld [vmem:[%s4275_s0 + $0x98] sm:$0xff]  ;;  %v15_v5 = vld [vmem:[%s4275_s0] sm:$0xff] }
  0x19   :  { %v128_v30 = vld [vmem:[%s4275_s0 + $0x388] sm:$0xff]  ;;  %v254_v35 = vadd.f32 %v253_v25, %v48_v24  ;;  %v50_v46 = vld [vmem:[%s4275_s0 + $0x118] sm:$0xff]  ;;  %v279_v50 = vadd.f32 %v34_v45, %v18_v44  ;;  %v47_v11 = vld [vmem:[%s4275_s0 + $0x100] sm:$0xff] }
  0x1a   :  { %1866 = vmatpush3.bf16.msra.mxu0 %v1865_v12  ;;  %v144_v33 = vld [vmem:[%s4275_s0 + $0x408] sm:$0xff]  ;;  %v66_v55 = vld [vmem:[%s4275_s0 + $0x198] sm:$0xff]  ;;  %v63_v15 = vld [vmem:[%s4275_s0 + $0x180] sm:$0xff] }
  0x1b   :  { %v160_v34 = vld [vmem:[%s4275_s0 + $0x488] sm:$0xff]  ;;  %1898 = vmatpush3.bf16.msra.mxu1 %v1897_v16  ;;  %1868 = vmatprep.subr.bf16.mxu0 %v1867_v17  ;;  %v461_v41 = vadd.f32 %v144_v33, %v128_v30  ;;  %v255_v43 = vadd.f32 %v254_v35, %v64_v29  ;;  %v130_v56 = vld [vmem:[%s4275_s0 + $0x398] sm:$0xff]  ;;  %v280_v63 = vadd.f32 %v279_v50, %v50_v46  ;;  %v111_v16 = vld [vmem:[%s4275_s0 + $0x300] sm:$0x1] }
  0x1c   :  { %v80_v38 = vld [vmem:[%s4275_s0 + $0x208] sm:$0xff]  ;;  %1900 = vmatprep.subr.bf16.mxu1 %v1899_v21  ;;  %v146_v57 = vld [vmem:[%s4275_s0 + $0x418] sm:$0xff]  ;;  %v239_v17 = vadd.f32 %v31_v10, %v15_v5  ;;  %v127_v22 = vld [vmem:[%s4275_s0 + $0x380] sm:$0xff] }
  0x1d   :  { %v112_v39 = vld [vmem:[%s4275_s0 + $0x308] sm:$0x1]  ;;  %v462_v49 = vadd.f32 %v461_v41, %v160_v34  ;;  %v256_v54 = vadd.f32 %v255_v43, %v80_v38  ;;  %v82_v61 = vld [vmem:[%s4275_s0 + $0x218] sm:$0xff]  ;;  %v487_v0 = vadd.f32 %v146_v57, %v130_v56  ;;  %v281_v8 = vadd.f32 %v280_v63, %v66_v55  ;;  %v143_v23 = vld [vmem:[%s4275_s0 + $0x400] sm:$0xff] }
  0x1e   :  { %v176_v40 = vld [vmem:[%s4275_s0 + $0x508] sm:$0xff]  ;;  %1870 = vmatpush3.bf16.msra.mxu0 %v1869_v31  ;;  %v258_v59 = vsel %vm244_vm0, %v112_v39, 0.0  ;;  %v162_v62 = vld [vmem:[%s4275_s0 + $0x498] sm:$0xff]  ;;  %v159_v24 = vld [vmem:[%s4275_s0 + $0x480] sm:$0xff]  ;;  %v240_v30 = vadd.f32 %v239_v17, %v47_v11  ;;  %v448_v31 = vadd.f32 %v143_v23, %v127_v22 }
  0x1f   :  { %v96_v47 = vld [vmem:[%s4275_s0 + $0x288] sm:$0xff]  ;;  %1902 = vmatpush3.bf16.msra.mxu1 %v1901_v36  ;;  %1872 = vmatprep.subr.bf16.mxu0 %v1871_v37  ;;  %v463_v60 = vadd.f32 %v462_v49, %v176_v40  ;;  %v98_v2 = vld [vmem:[%s4275_s0 + $0x298] sm:$0xff]  ;;  %v488_v9 = vadd.f32 %v487_v0, %v162_v62  ;;  %v282_v19 = vadd.f32 %v281_v8, %v82_v61  ;;  %v79_v28 = vld [vmem:[%s4275_s0 + $0x200] sm:$0xff]  ;;  %v245_v36 = vsel %vm244_vm0, %v111_v16, 0.0 }
  0x20   :  { %v192_v48 = vld [vmem:[%s4275_s0 + $0x588] sm:$0xff]  ;;  %1904 = vmatprep.subr.bf16.mxu1 %v1903_v42  ;;  %v257_v1 = vadd.f32 %v256_v54, %v96_v47  ;;  %v114_v3 = vld [vmem:[%s4275_s0 + $0x318] sm:$0x1]  ;;  %v175_v29 = vld [vmem:[%s4275_s0 + $0x500] sm:$0xff]  ;;  %v241_v41 = vadd.f32 %v240_v30, %v63_v15  ;;  %v449_v42 = vadd.f32 %v448_v31, %v159_v24 }
  0x21   :  { %v208_v53 = vld [vmem:[%s4275_s0 + $0x608] sm:$0xff]  ;;  %v178_v4 = vld [vmem:[%s4275_s0 + $0x518] sm:$0xff]  ;;  %v464_v6 = vadd.f32 %v463_v60, %v192_v48  ;;  %v284_v20 = vsel %vm244_vm0, %v114_v3, 0.0  ;;  %v283_v33 = vadd.f32 %v282_v19, %v98_v2  ;;  %v223_v35 = vld [vmem:[%s4275_s0 + $0x680] sm:$0x1] }
  0x22   :  { %v224_v58 = vld [vmem:[%s4275_s0 + $0x688] sm:$0x1]  ;;  %v226_v7 = vld [vmem:[%s4275_s0 + $0x698] sm:$0x1]  ;;  %1874 = vmatpush3.bf16.msra.mxu0 %v1873_v51  ;;  %v259_v12 = vadd.f32 %v258_v59, %v257_v1  ;;  %v489_v21 = vadd.f32 %v488_v9, %v178_v4  ;;  %v17_v37 = vld [vmem:[%s4275_s0 + $0x10] sm:$0xff]  ;;  %v453_v43 = vsel %vm244_vm0, %v223_v35, 0.0  ;;  %v450_v54 = vadd.f32 %v449_v42, %v175_v29 }
  0x23   :  { %v466_v13 = vsel %vm244_vm0, %v224_v58, 0.0  ;;  %v194_v14 = vld [vmem:[%s4275_s0 + $0x598] sm:$0xff]  ;;  %1906 = vmatpush3.bf16.msra.mxu1 %v1905_v52  ;;  %v465_v18 = vadd.f32 %v464_v6, %v208_v53  ;;  %v492_v27 = vsel %vm244_vm0, %v226_v7, 0.0  ;;  %v33_v38 = vld [vmem:[%s4275_s0 + $0x90] sm:$0xff]  ;;  %v95_v40 = vld [vmem:[%s4275_s0 + $0x280] sm:$0xff]  ;;  %v285_v46 = vadd.f32 %v284_v20, %v283_v33 }
  0x24   :  { %v260_v25 = vrot.slane %v259_v12, 4  ;;  %v210_v26 = vld [vmem:[%s4275_s0 + $0x618] sm:$0xff]  ;;  %v490_v34 = vadd.f32 %v489_v21, %v194_v14  ;;  %v49_v44 = vld [vmem:[%s4275_s0 + $0x110] sm:$0xff]  ;;  %v191_v48 = vld [vmem:[%s4275_s0 + $0x580] sm:$0xff]  ;;  %v266_v51 = vadd.f32 %v33_v38, %v17_v37  ;;  %v242_v53 = vadd.f32 %v241_v41, %v79_v28 }
  0x25   :  { %v467_v32 = vadd.f32 %v466_v13, %v465_v18  ;;  %v113_v49 = vld [vmem:[%s4275_s0 + $0x310] sm:$0x1]  ;;  %v286_v59 = vrot.slane %v285_v46, 4  ;;  %v207_v61 = vld [vmem:[%s4275_s0 + $0x600] sm:$0xff]  ;;  %v451_v2 = vadd.f32 %v450_v54, %v191_v48  ;;  %v737_v31 = vld [vmem:[%s4276_s1 + $0x288] sm:$0xff] }
  0x26   :  { %v261_v39 = vadd.f32 %v260_v25, %v259_v12  ;;  %v491_v47 = vadd.f32 %v490_v34, %v210_v26  ;;  %v129_v50 = vld [vmem:[%s4275_s0 + $0x390] sm:$0xff]  ;;  %v271_v57 = vsel %vm244_vm0, %v113_v49, 0.0  ;;  %v267_v63 = vadd.f32 %v266_v51, %v49_v44  ;;  %v736_v30 = vld [vmem:[%s4276_s1 + $0x280] sm:$0xff] }
  0x27   :  { %v468_v45 = vrot.slane %v467_v32, 4  ;;  %v65_v55 = vld [vmem:[%s4275_s0 + $0x190] sm:$0xff]  ;;  %v243_v1 = vadd.f32 %v242_v53, %v95_v40  ;;  %v287_v6 = vadd.f32 %v286_v59, %v285_v46  ;;  %v452_v12 = vadd.f32 %v451_v2, %v207_v61  ;;  %v768_v44 = vld [vmem:[%s4276_s1 + $0x380] sm:$0xff] }
  0x28   :  { %v262_v52 = vrot.slane %v261_v39, 2  ;;  %v145_v56 = vld [vmem:[%s4275_s0 + $0x410] sm:$0xff]  ;;  %v493_v60 = vadd.f32 %v492_v27, %v491_v47  ;;  %v268_v9 = vadd.f32 %v267_v63, %v65_v55  ;;  %v720_v61 = vld [vmem:[%s4276_s1 + $0x200] sm:$0xff] }
  0x29   :  { %v469_v58 = vadd.f32 %v468_v45, %v467_v32  ;;  %v161_v62 = vld [vmem:[%s4275_s0 + $0x490] sm:$0xff]  ;;  %v474_v4 = vadd.f32 %v145_v56, %v129_v50  ;;  %v246_v11 = vadd.f32 %v245_v36, %v243_v1  ;;  %v288_v16 = vrot.slane %v287_v6, 2  ;;  %v769_v45 = vld [vmem:[%s4276_s1 + $0x388] sm:$0xff] }
  0x2a   :  { %v263_v0 = vadd.f32 %v262_v52, %v261_v39  ;;  %v81_v3 = vld [vmem:[%s4275_s0 + $0x210] sm:$0xff]  ;;  %v494_v7 = vrot.slane %v493_v60, 4  ;;  %v454_v23 = vadd.f32 %v453_v43, %v452_v12  ;;  %v1907_v43 = vpack.c.bf16 %v737_v31, %v736_v30  ;;  %v2560_v12 = vld [vmem:[%s4276_s1 + $0x308] sm:$0xff] }
  0x2b   :  { %v470_v5 = vrot.slane %v469_v58, 2  ;;  %v177_v8 = vld [vmem:[%s4275_s0 + $0x510] sm:$0xff]  ;;  %v475_v14 = vadd.f32 %v474_v4, %v161_v62  ;;  %v269_v20 = vadd.f32 %v268_v9, %v81_v3  ;;  %v247_v22 = vrot.slane %v246_v11, 4  ;;  %v721_v62 = vld [vmem:[%s4276_s1 + $0x208] sm:$0xff]  ;;  %v739_v3 = vld [vmem:[%s4276_s1 + $0x298] sm:$0xff] }
  0x2c   :  { %v264_v10 = vrot.slane %v263_v0, 1  ;;  %v97_v13 = vld [vmem:[%s4275_s0 + $0x290] sm:$0xff]  ;;  %v495_v17 = vadd.f32 %v494_v7, %v493_v60  ;;  %v289_v26 = vadd.f32 %v288_v16, %v287_v6  ;;  %v455_v33 = vrot.slane %v454_v23, 4  ;;  %1908 = vmatprep.subr.bf16.mxu0 %v1907_v43  ;;  %v2550_v9 = vld [vmem:[%s4276_s1 + $0x218] sm:$0xff]  ;;  %v2575_v16 = vld [vmem:[%s4276_s1 + $0x2a0] sm:$0xff] }
  0x2d   :  { %v471_v15 = vadd.f32 %v470_v5, %v469_v58  ;;  %v193_v18 = vld [vmem:[%s4275_s0 + $0x590] sm:$0xff]  ;;  %v476_v24 = vadd.f32 %v475_v14, %v177_v8  ;;  %v270_v29 = vadd.f32 %v269_v20, %v97_v13  ;;  %v248_v32 = vadd.f32 %v247_v22, %v246_v11  ;;  %v2555_v11 = vld [vmem:[%s4276_s1 + $0x300] sm:$0xff]  ;;  %v2685_v43 = vld [vmem:[%s4276_s1 + $0x248] sm:$0xff] }
  0x2e   :  { %v225_v19 = vld [vmem:[%s4275_s0 + $0x690] sm:$0x1]  ;;  %v265_v21 = vadd.f32 %v264_v10, %v263_v0  ;;  %v496_v27 = vrot.slane %v495_v17, 2  ;;  %v290_v37 = vrot.slane %v289_v26, 1  ;;  %v456_v41 = vadd.f32 %v455_v33, %v454_v23  ;;  %v2596_v22 = vld [vmem:[%s4276_s1 + $0x220] sm:$0xff]  ;;  %v2601_v23 = vld [vmem:[%s4276_s1 + $0x228] sm:$0xff] }
  0x2f   :  { %v472_v25 = vrot.slane %v471_v15, 1  ;;  %v209_v28 = vld [vmem:[%s4275_s0 + $0x610] sm:$0xff]  ;;  %v477_v34 = vadd.f32 %v476_v24, %v193_v18  ;;  %v479_v35 = vsel %vm244_vm0, %v225_v19, 0.0  ;;  %v272_v39 = vadd.f32 %v271_v57, %v270_v29  ;;  %v2606_v24 = vld [vmem:[%s4276_s1 + $0x3a0] sm:$0xff]  ;;  %v2631_v29 = vld [vmem:[%s4276_s1 + $0x2b8] sm:$0xff] }
  0x30   :  { %v497_v38 = vadd.f32 %v496_v27, %v495_v17  ;;  %v249_v40 = vrot.slane %v248_v32, 2  ;;  %v291_v47 = vadd.f32 %v290_v37, %v289_v26  ;;  %v457_v51 = vrot.slane %v456_v41, 2  ;;  %v738_v2 = vld [vmem:[%s4276_s1 + $0x290] sm:$0xff]  ;;  %v2580_v17 = vld [vmem:[%s4276_s1 + $0x2a8] sm:$0xff]  ;;  %v2616_v26 = vld [vmem:[%s4276_s1 + $0x320] sm:$0xff] }
  0x31   :  { %v473_v36 = vadd.f32 %v472_v25, %v471_v15  ;;  %v478_v42 = vadd.f32 %v477_v34, %v209_v28  ;;  %v273_v49 = vrot.slane %v272_v39, 4  ;;  %v1939_v55 = vpack.c.bf16 %v769_v45, %v768_v44  ;;  %v2545_v8 = vld [vmem:[%s4276_s1 + $0x210] sm:$0xff]  ;;  %v2570_v15 = vld [vmem:[%s4276_s1 + $0x398] sm:$0xff]  ;;  %v2611_v25 = vld [vmem:[%s4276_s1 + $0x3a8] sm:$0xff] }
  0x32   :  { %v498_v48 = vrot.slane %v497_v38, 1  ;;  %v250_v50 = vadd.f32 %v249_v40, %v248_v32  ;;  %v458_v57 = vadd.f32 %v457_v51, %v456_v41  ;;  %v1909_v7 = vpack.c.bf16 %v721_v62, %v720_v61  ;;  %v2565_v14 = vld [vmem:[%s4276_s1 + $0x390] sm:$0xff]  ;;  %v2621_v27 = vld [vmem:[%s4276_s1 + $0x328] sm:$0xff]  ;;  %v2643_v34 = vld [vmem:[%s4276_s1 + $0x238] sm:$0xff] }
  0x33   :  { %v946_v46 = vsel %vm944_vm1, %v473_v36, %v265_v21  ;;  %v480_v52 = vadd.f32 %v479_v35, %v478_v42  ;;  %v274_v54 = vadd.f32 %v273_v49, %v272_v39  ;;  %1940 = vmatprep.subr.bf16.mxu1 %v1939_v55  ;;  %v1911_v13 = vpack.c.bf16 %v739_v3, %v738_v2  ;;  %v2586_v20 = vld [vmem:[%s4276_s1 + $0x310] sm:$0xff]  ;;  %v2591_v21 = vld [vmem:[%s4276_s1 + $0x318] sm:$0xff]  ;;  %v2670_v40 = vld [vmem:[%s4276_s1 + $0x2c0] sm:$0xff] }
  0x34   :  { %1041 = vmatprep.mubr.f32.mxu0 %v946_v46  ;;  %v499_v53 = vadd.f32 %v498_v48, %v497_v38  ;;  %v251_v56 = vrot.slane %v250_v50, 1  ;;  %v459_v0 = vrot.slane %v458_v57, 1  ;;  %v2626_v28 = vld [vmem:[%s4276_s1 + $0x2b0] sm:$0xff]  ;;  %v1913_v33 = vpack.c.bf16 %v2550_v9, %v2545_v8  ;;  %v2653_v36 = vld [vmem:[%s4276_s1 + $0x3b8] sm:$0xff]  ;;  %v2675_v41 = vld [vmem:[%s4276_s1 + $0x2c8] sm:$0xff] }
  0x35   :  { %v481_v58 = vrot.slane %v480_v52, 4  ;;  %v275_v60 = vrot.slane %v274_v54, 2  ;;  %v2636_v30 = vld [vmem:[%s4276_s1 + $0x230] sm:$0xff]  ;;  %v1915_v37 = vpack.c.bf16 %v2580_v17, %v2575_v16  ;;  %v2665_v39 = vld [vmem:[%s4276_s1 + $0x338] sm:$0xff]  ;;  %v2680_v42 = vld [vmem:[%s4276_s1 + $0x240] sm:$0xff]  ;;  %v1941_v49 = vpack.c.bf16 %v2560_v12, %v2555_v11 }
  0x36   :  { %v948_v59 = vsel %vm944_vm1, %v499_v53, %v291_v47  ;;  %v252_v63 = vadd.f32 %v251_v56, %v250_v50  ;;  %v460_v5 = vadd.f32 %v459_v0, %v458_v57  ;;  %v2648_v35 = vld [vmem:[%s4276_s1 + $0x3b0] sm:$0xff]  ;;  %v2690_v44 = vld [vmem:[%s4276_s1 + $0x3c0] sm:$0xff]  ;;  %v2695_v45 = vld [vmem:[%s4276_s1 + $0x3c8] sm:$0xff]  ;;  %v1943_v50 = vpack.c.bf16 %v2570_v15, %v2565_v14 }
  0x37   :  { %1111 = vmatprep.mubr.f32.mxu1 %v948_v59  ;;  %v482_v1 = vadd.f32 %v481_v58, %v480_v52  ;;  %v276_v4 = vadd.f32 %v275_v60, %v274_v54  ;;  %v2660_v38 = vld [vmem:[%s4276_s1 + $0x330] sm:$0xff]  ;;  %v20_v46 = vld [vmem:[%s4275_s0 + $0x28] sm:$0xff]  ;;  %v2710_v51 = vld [vmem:[%s4276_s1 + $0x340] sm:$0xff]  ;;  %v1945_v54 = vpack.c.bf16 %v2591_v21, %v2586_v20  ;;  %v1917_v55 = vpack.c.bf16 %v2601_v23, %v2596_v22 }
  0x38   :  { %v945_v18 = vsel %vm944_vm1, %v460_v5, %v252_v63  ;;  %v36_v47 = vld [vmem:[%s4275_s0 + $0xa8] sm:$0xff]  ;;  %v1947_v56 = vpack.c.bf16 %v2611_v25, %v2606_v24  ;;  %v2729_v57 = vld [vmem:[%s4276_s1 + $0x2d0] sm:$0xff]  ;;  %v2734_v58 = vld [vmem:[%s4276_s1 + $0x2d8] sm:$0xff]  ;;  %v1919_v5 = vpack.c.bf16 %v2631_v29, %v2626_v28 }
  0x39   :  { %v483_v6 = vrot.slane %v482_v1, 2  ;;  %v277_v10 = vrot.slane %v276_v4, 1  ;;  %1042 = vmatmul.mubr.f32.vlgmr.msra.gmra.mrb[0].mxu0 %v945_v18  ;;  %v2715_v52 = vld [vmem:[%s4276_s1 + $0x348] sm:$0xff]  ;;  %v2739_v59 = vld [vmem:[%s4276_s1 + $0x250] sm:$0xff]  ;;  %v2744_v60 = vld [vmem:[%s4276_s1 + $0x258] sm:$0xff]  ;;  %v305_v2 = vadd.f32 %v36_v47, %v20_v46 }
  0x3a   :  { %1910 = vmatpush3.bf16.msra.mxu0 %v1909_v7  ;;  %v52_v53 = vld [vmem:[%s4275_s0 + $0x128] sm:$0xff]  ;;  %v2749_v61 = vld [vmem:[%s4276_s1 + $0x3d0] sm:$0xff]  ;;  %v2754_v62 = vld [vmem:[%s4276_s1 + $0x3d8] sm:$0xff] }
  0x3b   :  { %v484_v19 = vadd.f32 %v483_v6, %v482_v1  ;;  %v278_v31 = vadd.f32 %v277_v10, %v276_v4  ;;  %1912 = vmatprep.subr.bf16.mxu0 %v1911_v13  ;;  %v2759_v63 = vld [vmem:[%s4276_s1 + $0x350] sm:$0xff]  ;;  %v2764_v0 = vld [vmem:[%s4276_s1 + $0x358] sm:$0xff]  ;;  %v132_v1 = vld [vmem:[%s4275_s0 + $0x3a8] sm:$0xff]  ;;  %v1921_v6 = vpack.c.bf16 %v2643_v34, %v2636_v30  ;;  %v4279_v34 = vpack.c.bf16 %v2675_v41, %v2670_v40 }
  0x3c   :  { %v2779_v7 = vld [vmem:[%s4276_s1 + $0x2e0] sm:$0xff]  ;;  %v2784_v8 = vld [vmem:[%s4276_s1 + $0x2e8] sm:$0xff]  ;;  %v2882_v4 = vld [vmem:[%s4276_s1 + $0x270] sm:$0xff]  ;;  %v4280_v41 = vpack.c.bf16 %v2621_v27, %v2616_v26 }
  0x3d   :  { %v485_v32 = vrot.slane %v484_v19, 1  ;;  %v68_v9 = vld [vmem:[%s4275_s0 + $0x1a8] sm:$0xff]  ;;  %v2800_v13 = vld [vmem:[%s4276_s1 + $0x260] sm:$0xff]  ;;  %v134_v40 = vld [vmem:[%s4275_s0 + $0x3b8] sm:$0xff] }
  0x3e   :  { %1914 = vmatpush3.bf16.msra.mxu0 %v1913_v33  ;;  %v148_v10 = vld [vmem:[%s4275_s0 + $0x428] sm:$0xff]  ;;  %v2810_v15 = vld [vmem:[%s4276_s1 + $0x3e0] sm:$0xff]  ;;  %v166_v26 = vld [vmem:[%s4275_s0 + $0x4b8] sm:$0xff] }
  0x3f   :  { %v486_v48 = vadd.f32 %v485_v32, %v484_v19  ;;  %v164_v11 = vld [vmem:[%s4275_s0 + $0x4a8] sm:$0xff]  ;;  %1916 = vmatprep.subr.bf16.mxu0 %v1915_v37  ;;  %v306_v19 = vadd.f32 %v305_v2, %v52_v53  ;;  %v513_v22 = vadd.f32 %v148_v10, %v132_v1  ;;  %v2834_v32 = vld [vmem:[%s4276_s1 + $0x360] sm:$0xff]  ;;  %v2860_v53 = vld [vmem:[%s4276_s1 + $0x2f8] sm:$0xff] }
  0x40   :  { %v2805_v14 = vld [vmem:[%s4276_s1 + $0x268] sm:$0xff]  ;;  %v19_v37 = vld [vmem:[%s4275_s0 + $0x20] sm:$0xff] }
  0x41   :  { %v947_v3 = vsel %vm944_vm1, %v486_v48, %v278_v31  ;;  %v2815_v16 = vld [vmem:[%s4276_s1 + $0x3e8] sm:$0xff]  ;;  %v35_v46 = vld [vmem:[%s4275_s0 + $0xa0] sm:$0xff]  ;;  %v514_v10 = vadd.f32 %v513_v22, %v164_v11  ;;  %v1933_v31 = vpack.c.bf16 %v2805_v14, %v2800_v13  ;;  %v101_v13 = vld [vmem:[%s4275_s0 + $0x2b0] sm:$0xff] }
  0x42   :  { %1112 = vmatmul.mubr.f32.vlgmr.msra.gmra.mrb[0].mxu1 %v947_v3  ;;  %v84_v17 = vld [vmem:[%s4275_s0 + $0x228] sm:$0xff]  ;;  %v51_v47 = vld [vmem:[%s4275_s0 + $0x120] sm:$0xff]  ;;  %v307_v3 = vadd.f32 %v306_v19, %v68_v9  ;;  %v292_v48 = vadd.f32 %v35_v46, %v19_v37  ;;  %1918 = vmatpush3.bf16.msra.mxu0 %v1917_v55  ;;  %v2887_v55 = vld [vmem:[%s4276_s1 + $0x278] sm:$0xff]  ;;  %v1963_v28 = vpack.c.bf16 %v2815_v16, %v2810_v15 }
  0x43   :  { %v180_v18 = vld [vmem:[%s4275_s0 + $0x528] sm:$0xff]  ;;  %1942 = vmatpush3.bf16.msra.mxu1 %v1941_v49  ;;  %v2855_v49 = vld [vmem:[%s4276_s1 + $0x2f0] sm:$0xff]  ;;  %v67_v9 = vld [vmem:[%s4275_s0 + $0x1a0] sm:$0xff]  ;;  %1920 = vmatprep.subr.bf16.mxu0 %v1919_v5 }
  0x44   :  { %v2839_v33 = vld [vmem:[%s4276_s1 + $0x368] sm:$0xff]  ;;  %1944 = vmatprep.subr.bf16.mxu1 %v1943_v50  ;;  %v131_v11 = vld [vmem:[%s4275_s0 + $0x3a0] sm:$0xff]  ;;  %v2903_v37 = vld [vmem:[%s4276_s1 + $0x3f0] sm:$0xff]  ;;  %v308_v29 = vadd.f32 %v307_v3, %v84_v17  ;;  %v515_v23 = vadd.f32 %v514_v10, %v180_v18  ;;  %v293_v22 = vadd.f32 %v292_v48, %v51_v47 }
  0x45   :  { %v100_v1 = vld [vmem:[%s4275_s0 + $0x2a8] sm:$0xff]  ;;  %v147_v19 = vld [vmem:[%s4275_s0 + $0x420] sm:$0xff]  ;;  %v2908_v46 = vld [vmem:[%s4276_s1 + $0x3f8] sm:$0xff] }
  0x46   :  { %v116_v50 = vld [vmem:[%s4275_s0 + $0x328] sm:$0x1]  ;;  %v163_v5 = vld [vmem:[%s4275_s0 + $0x4a0] sm:$0xff]  ;;  %v500_v21 = vadd.f32 %v147_v19, %v131_v11  ;;  %v2941_v48 = vld [vmem:[%s4276_s1 + $0x370] sm:$0xff]  ;;  %v309_v3 = vadd.f32 %v308_v29, %v100_v1  ;;  %v294_v25 = vadd.f32 %v293_v22, %v67_v9  ;;  %1922 = vmatpush3.bf16.msra.mxu0 %v1921_v6  ;;  %v1937_v6 = vpack.c.bf16 %v2887_v55, %v2882_v4 }
  0x47   :  { %v196_v2 = vld [vmem:[%s4275_s0 + $0x5a8] sm:$0xff]  ;;  %1946 = vmatpush3.bf16.msra.mxu1 %v1945_v54  ;;  %v310_v18 = vsel %vm244_vm0, %v116_v50, 0.0  ;;  %v83_v47 = vld [vmem:[%s4275_s0 + $0x220] sm:$0xff]  ;;  %v2946_v50 = vld [vmem:[%s4276_s1 + $0x378] sm:$0xff]  ;;  %1924 = vmatprep.subr.bf16.mxu0 %v4279_v34 }
  0x48   :  { %v228_v12 = vld [vmem:[%s4275_s0 + $0x6a8] sm:$0x1]  ;;  %v115_v20 = vld [vmem:[%s4275_s0 + $0x320] sm:$0x1]  ;;  %1948 = vmatprep.subr.bf16.mxu1 %v1947_v56  ;;  %v516_v10 = vadd.f32 %v515_v23, %v196_v2  ;;  %v22_v56 = vld [vmem:[%s4275_s0 + $0x38] sm:$0xff]  ;;  %v1935_v23 = vpack.c.bf16 %v2860_v53, %v2855_v49  ;;  %v501_v9 = vadd.f32 %v500_v21, %v163_v5  ;;  %v295_v21 = vadd.f32 %v294_v25, %v83_v47 }
  0x49   :  { %v212_v17 = vld [vmem:[%s4275_s0 + $0x628] sm:$0xff]  ;;  %v179_v24 = vld [vmem:[%s4275_s0 + $0x520] sm:$0xff]  ;;  %v38_v11 = vld [vmem:[%s4275_s0 + $0xb8] sm:$0xff]  ;;  %v518_v29 = vsel %vm244_vm0, %v228_v12, 0.0  ;;  %v311_v12 = vadd.f32 %v310_v18, %v309_v3  ;;  %v297_v18 = vsel %vm244_vm0, %v115_v20, 0.0  ;;  %v4281_v25 = vpack.c.bf16 %v2653_v36, %v2648_v35 }
  0x4a   :  { %v99_v1 = vld [vmem:[%s4275_s0 + $0x2a0] sm:$0xff]  ;;  %v54_v19 = vld [vmem:[%s4275_s0 + $0x138] sm:$0xff]  ;;  %v331_v30 = vadd.f32 %v38_v11, %v22_v56  ;;  %v517_v22 = vadd.f32 %v516_v10, %v212_v17  ;;  %v1967_v17 = vpack.c.bf16 %v2908_v46, %v2903_v37  ;;  %v502_v3 = vadd.f32 %v501_v9, %v179_v24  ;;  %v3012_v9 = vld [vmem:[%s4276_s1 + $0x488] sm:$0xff] }
  0x4b   :  { %v195_v2 = vld [vmem:[%s4275_s0 + $0x5a0] sm:$0xff]  ;;  %v70_v56 = vld [vmem:[%s4275_s0 + $0x1b8] sm:$0xff]  ;;  %1950 = vmatpush3.bf16.msra.mxu1 %v4280_v41  ;;  %v312_v20 = vrot.slane %v311_v12, 4  ;;  %v296_v11 = vadd.f32 %v295_v21, %v99_v1  ;;  %v4282_v35 = vpack.c.bf16 %v2685_v43, %v2680_v42  ;;  %v1969_v36 = vpack.c.bf16 %v2946_v50, %v2941_v48  ;;  %v197_v14 = vld [vmem:[%s4275_s0 + $0x5b0] sm:$0xff] }
  0x4c   :  { %v211_v54 = vld [vmem:[%s4275_s0 + $0x620] sm:$0xff]  ;;  %v150_v10 = vld [vmem:[%s4275_s0 + $0x438] sm:$0xff]  ;;  %v332_v27 = vadd.f32 %v331_v30, %v54_v19  ;;  %1952 = vmatprep.subr.bf16.mxu1 %v4281_v25  ;;  %v519_v24 = vadd.f32 %v518_v29, %v517_v22  ;;  %v503_v29 = vadd.f32 %v502_v3, %v195_v2  ;;  %v21_v3 = vld [vmem:[%s4275_s0 + $0x30] sm:$0xff]  ;;  %v4285_v25 = vpack.c.bf16 %v2695_v45, %v2690_v44 }
  0x4d   :  { %v227_v5 = vld [vmem:[%s4275_s0 + $0x6a0] sm:$0x1]  ;;  %v86_v34 = vld [vmem:[%s4275_s0 + $0x238] sm:$0xff]  ;;  %v539_v30 = vadd.f32 %v150_v10, %v134_v40  ;;  %1926 = vmatpush3.bf16.msra.mxu0 %v4282_v35  ;;  %v4283_v40 = vpack.c.bf16 %v2734_v58, %v2729_v57  ;;  %v313_v42 = vadd.f32 %v312_v20, %v311_v12  ;;  %v298_v10 = vadd.f32 %v297_v18, %v296_v11  ;;  %v149_v35 = vld [vmem:[%s4275_s0 + $0x430] sm:$0xff] }
  0x4e   :  { %v2998_v47 = vld [vmem:[%s4276_s1 + $0x480] sm:$0xff]  ;;  %v118_v19 = vld [vmem:[%s4275_s0 + $0x338] sm:$0x1]  ;;  %v505_v1 = vsel %vm244_vm0, %v227_v5, 0.0  ;;  %v333_v41 = vadd.f32 %v332_v27, %v70_v56  ;;  %v520_v43 = vrot.slane %v519_v24, 4  ;;  %v37_v56 = vld [vmem:[%s4275_s0 + $0xb0] sm:$0xff]  ;;  %v4284_v57 = vpack.c.bf16 %v2665_v39, %v2660_v38 }
  0x4f   :  { %v102_v22 = vld [vmem:[%s4275_s0 + $0x2b8] sm:$0xff]  ;;  %1928 = vmatprep.subr.bf16.mxu0 %v4283_v40  ;;  %v540_v5 = vadd.f32 %v539_v30, %v166_v26  ;;  %v504_v58 = vadd.f32 %v503_v29, %v211_v54  ;;  %v1971_v12 = vpack.c.bf16 %v3012_v9, %v2998_v47  ;;  %v336_v27 = vsel %vm244_vm0, %v118_v19, 0.0  ;;  %v53_v39 = vld [vmem:[%s4275_s0 + $0x130] sm:$0xff]  ;;  %v785_v16 = vld [vmem:[%s4276_s1 + $0x408] sm:$0xff] }
  0x50   :  { %v182_v21 = vld [vmem:[%s4275_s0 + $0x538] sm:$0xff]  ;;  %1954 = vmatpush3.bf16.msra.mxu1 %v4284_v57  ;;  %v334_v26 = vadd.f32 %v333_v41, %v86_v34  ;;  %v314_v20 = vrot.slane %v313_v42, 2  ;;  %v521_v11 = vadd.f32 %v520_v43, %v519_v24  ;;  %v299_v30 = vrot.slane %v298_v10, 4  ;;  %v133_v54 = vld [vmem:[%s4275_s0 + $0x3b0] sm:$0xff] }
  0x51   :  { %v230_v2 = vld [vmem:[%s4275_s0 + $0x6b8] sm:$0x1]  ;;  %1956 = vmatprep.subr.bf16.mxu1 %v4285_v25  ;;  %v541_v38 = vadd.f32 %v540_v5, %v182_v21  ;;  %v4286_v34 = vpack.c.bf16 %v2744_v60, %v2739_v59  ;;  %v506_v19 = vadd.f32 %v505_v1, %v504_v58  ;;  %v318_v29 = vadd.f32 %v37_v56, %v21_v3  ;;  %v69_v40 = vld [vmem:[%s4275_s0 + $0x1b0] sm:$0xff] }
  0x52   :  { %v198_v18 = vld [vmem:[%s4275_s0 + $0x5b8] sm:$0xff]  ;;  %v335_v45 = vadd.f32 %v334_v26, %v102_v22  ;;  %v544_v24 = vsel %vm244_vm0, %v230_v2, 0.0  ;;  %v4287_v21 = vpack.c.bf16 %v2784_v8, %v2779_v7  ;;  %v315_v41 = vadd.f32 %v314_v20, %v313_v42  ;;  %v165_v22 = vld [vmem:[%s4275_s0 + $0x4b0] sm:$0xff] }
  0x53   :  { %1930 = vmatpush3.bf16.msra.mxu0 %v4286_v34  ;;  %v214_v44 = vld [vmem:[%s4275_s0 + $0x638] sm:$0xff]  ;;  %v522_v59 = vrot.slane %v521_v11, 2  ;;  %v300_v60 = vadd.f32 %v299_v30, %v298_v10  ;;  %v542_v1 = vadd.f32 %v541_v38, %v198_v18  ;;  %v4288_v43 = vpack.c.bf16 %v2715_v52, %v2710_v51  ;;  %v85_v58 = vld [vmem:[%s4275_s0 + $0x230] sm:$0xff] }
  0x54   :  { %1932 = vmatprep.subr.bf16.mxu0 %v4287_v21  ;;  %v507_v2 = vrot.slane %v506_v19, 4  ;;  %v337_v5 = vadd.f32 %v336_v27, %v335_v45  ;;  %v319_v7 = vadd.f32 %v318_v29, %v53_v39  ;;  %v526_v8 = vadd.f32 %v149_v35, %v133_v54  ;;  %v181_v51 = vld [vmem:[%s4275_s0 + $0x530] sm:$0xff]  ;;  %v833_v45 = vld [vmem:[%s4276_s1 + $0x588] sm:$0xff]  ;;  %v803_v47 = vld [vmem:[%s4276_s1 + $0x498] sm:$0xff] }
  0x55   :  { %1958 = vmatpush3.bf16.msra.mxu1 %v4288_v43  ;;  %v4289_v42 = vpack.c.bf16 %v2754_v62, %v2749_v61  ;;  %v316_v10 = vrot.slane %v315_v41, 1  ;;  %v523_v3 = vadd.f32 %v522_v59, %v521_v11  ;;  %v301_v56 = vrot.slane %v300_v60, 2  ;;  %v117_v61 = vld [vmem:[%s4275_s0 + $0x330] sm:$0x1] }
  0x56   :  { %v543_v57 = vadd.f32 %v542_v1, %v214_v44  ;;  %v508_v52 = vadd.f32 %v507_v2, %v506_v19  ;;  %v338_v18 = vrot.slane %v337_v5, 4  ;;  %v320_v62 = vadd.f32 %v319_v7, %v69_v40  ;;  %v229_v49 = vld [vmem:[%s4275_s0 + $0x6b0] sm:$0x1] }
  0x57   :  { %1960 = vmatprep.subr.bf16.mxu1 %v4289_v42  ;;  %1934 = vmatpush3.bf16.msra.mxu0 %v1933_v31  ;;  %v527_v26 = vadd.f32 %v526_v8, %v165_v22  ;;  %v317_v27 = vadd.f32 %v316_v10, %v315_v41  ;;  %v524_v25 = vrot.slane %v523_v3, 1  ;;  %v302_v20 = vadd.f32 %v301_v56, %v300_v60  ;;  %v802_v40 = vld [vmem:[%s4276_s1 + $0x490] sm:$0xff]  ;;  %v787_v42 = vld [vmem:[%s4276_s1 + $0x418] sm:$0xff]  ;;  %v804_v10 = vld [vmem:[%s4276_s1 + $0x4a0] sm:$0xff] }
  0x58   :  { %1936 = vmatprep.subr.bf16.mxu0 %v1935_v23  ;;  %v545_v11 = vadd.f32 %v544_v24, %v543_v57  ;;  %v4290_v31 = vpack.c.bf16 %v2764_v0, %v2759_v63  ;;  %v509_v30 = vrot.slane %v508_v52, 2  ;;  %v339_v38 = vadd.f32 %v338_v18, %v337_v5  ;;  %v784_v63 = vld [vmem:[%s4276_s1 + $0x400] sm:$0xff]  ;;  %v213_v0 = vld [vmem:[%s4275_s0 + $0x630] sm:$0xff] }
  0x59   :  { %v321_v53 = vadd.f32 %v320_v62, %v85_v58  ;;  %v528_v23 = vadd.f32 %v527_v26, %v181_v51  ;;  %v525_v39 = vadd.f32 %v524_v25, %v523_v3  ;;  %v303_v54 = vrot.slane %v302_v20, 1  ;;  %v786_v8 = vld [vmem:[%s4276_s1 + $0x410] sm:$0xff]  ;;  %v805_v3 = vld [vmem:[%s4276_s1 + $0x4a8] sm:$0xff]  ;;  %v3172_v51 = vld [vmem:[%s4276_s1 + $0x500] sm:$0xff] }
  0x5a   :  { %1962 = vmatpush3.bf16.msra.mxu1 %v4290_v31  ;;  %v546_v34 = vrot.slane %v545_v11, 4  ;;  %v323_v19 = vsel %vm244_vm0, %v117_v61, 0.0  ;;  %v510_v44 = vadd.f32 %v509_v30, %v508_v52  ;;  %v340_v15 = vrot.slane %v339_v38, 2  ;;  %v3177_v52 = vld [vmem:[%s4276_s1 + $0x508] sm:$0xff]  ;;  %v3182_v18 = vld [vmem:[%s4276_s1 + $0x590] sm:$0xff]  ;;  %v3187_v61 = vld [vmem:[%s4276_s1 + $0x598] sm:$0xff] }
  0x5b   :  { %1964 = vmatprep.subr.bf16.mxu1 %v1963_v28  ;;  %1938 = vmatpush3.bf16.msra.mxu0 %v1937_v6  ;;  %v832_v28 = vld [vmem:[%s4276_s1 + $0x580] sm:$0xff]  ;;  %v322_v24 = vadd.f32 %v321_v53, %v101_v13  ;;  %v529_v35 = vadd.f32 %v528_v23, %v197_v14  ;;  %v950_v29 = vsel %vm944_vm1, %v525_v39, %v317_v27  ;;  %v531_v6 = vsel %vm244_vm0, %v229_v49, 0.0  ;;  %v789_v27 = vld [vmem:[%s4276_s1 + $0x428] sm:$0xff]  ;;  %v3203_v13 = vld [vmem:[%s4276_s1 + $0x518] sm:$0xff] }
  0x5c   :  { %v304_v4 = vadd.f32 %v303_v54, %v302_v20  ;;  %1972 = vmatprep.subr.bf16.mxu0 %v1971_v12  ;;  %v547_v55 = vadd.f32 %v546_v34, %v545_v11  ;;  %v4291_v21 = vpack.c.bf16 %v2839_v33, %v2834_v32  ;;  %1181 = vmatprep.mubr.f32.mxu0 %v950_v29  ;;  %v511_v41 = vrot.slane %v510_v44, 1  ;;  %v788_v26 = vld [vmem:[%s4276_s1 + $0x420] sm:$0xff]  ;;  %v3198_v11 = vld [vmem:[%s4276_s1 + $0x510] sm:$0xff]  ;;  %v3213_v31 = vld [vmem:[%s4276_s1 + $0x5a8] sm:$0xff] }
  0x5d   :  { %v341_v59 = vadd.f32 %v340_v15, %v339_v38  ;;  %v324_v60 = vadd.f32 %v323_v19, %v322_v24  ;;  %v530_v1 = vadd.f32 %v529_v35, %v213_v0  ;;  %v1973_v32 = vpack.c.bf16 %v785_v16, %v784_v63  ;;  %v3208_v14 = vld [vmem:[%s4276_s1 + $0x5a0] sm:$0xff]  ;;  %v3223_v38 = vld [vmem:[%s4276_s1 + $0x528] sm:$0xff]  ;;  %v806_v49 = vld [vmem:[%s4276_s1 + $0x4b0] sm:$0xff] }
  0x5e   :  { %1966 = vmatpush3.bf16.msra.mxu1 %v4291_v21  ;;  %v548_v9 = vrot.slane %v547_v55, 2  ;;  %v2003_v33 = vpack.c.bf16 %v833_v45, %v832_v28  ;;  %v512_v12 = vadd.f32 %v511_v41, %v510_v44  ;;  %v1975_v7 = vpack.c.bf16 %v803_v47, %v802_v40  ;;  %v3218_v30 = vld [vmem:[%s4276_s1 + $0x520] sm:$0xff]  ;;  %v807_v53 = vld [vmem:[%s4276_s1 + $0x4b8] sm:$0xff]  ;;  %v3235_v39 = vld [vmem:[%s4276_s1 + $0x430] sm:$0xff] }
  0x5f   :  { %1968 = vmatprep.subr.bf16.mxu1 %v1967_v17  ;;  %v342_v22 = vrot.slane %v341_v59, 1  ;;  %v325_v43 = vrot.slane %v324_v60, 4  ;;  %v532_v2 = vadd.f32 %v531_v6, %v530_v1  ;;  %v1977_v50 = vpack.c.bf16 %v787_v42, %v786_v8  ;;  %v3240_v54 = vld [vmem:[%s4276_s1 + $0x438] sm:$0xff]  ;;  %v3245_v34 = vld [vmem:[%s4276_s1 + $0x5b0] sm:$0xff]  ;;  %v3265_v28 = vld [vmem:[%s4276_s1 + $0x4c0] sm:$0xff] }
  0x60   :  { %v549_v5 = vadd.f32 %v548_v9, %v547_v55  ;;  %v949_v37 = vsel %vm944_vm1, %v512_v12, %v304_v4  ;;  %v1979_v62 = vpack.c.bf16 %v805_v3, %v804_v10  ;;  %v3250_v63 = vld [vmem:[%s4276_s1 + $0x5b8] sm:$0xff]  ;;  %v3255_v0 = vld [vmem:[%s4276_s1 + $0x530] sm:$0xff]  ;;  %v1981_v16 = vpack.c.bf16 %v789_v27, %v788_v26  ;;  %v3270_v45 = vld [vmem:[%s4276_s1 + $0x4c8] sm:$0xff] }
  0x61   :  { %v326_v46 = vadd.f32 %v325_v43, %v324_v60  ;;  %v533_v17 = vrot.slane %v532_v2, 4  ;;  %1182 = vmatmul.mubr.f32.vlgmr.msra.gmra.mrb[2].mxu0 %v949_v37  ;;  %v343_v56 = vadd.f32 %v342_v22, %v341_v59  ;;  %v3260_v19 = vld [vmem:[%s4276_s1 + $0x538] sm:$0xff]  ;;  %v3275_v24 = vld [vmem:[%s4276_s1 + $0x440] sm:$0xff]  ;;  %v3280_v35 = vld [vmem:[%s4276_s1 + $0x448] sm:$0xff]  ;;  %v1983_v29 = vpack.c.bf16 %v807_v53, %v806_v49 }
  0x62   :  { %1970 = vmatpush3.bf16.msra.mxu1 %v1969_v36  ;;  %v550_v57 = vrot.slane %v549_v5, 1  ;;  %1974 = vmatpush3.bf16.msra.mxu0 %v1973_v32  ;;  %v3285_v4 = vld [vmem:[%s4276_s1 + $0x5c0] sm:$0xff]  ;;  %v3290_v55 = vld [vmem:[%s4276_s1 + $0x5c8] sm:$0xff]  ;;  %v3305_v41 = vld [vmem:[%s4276_s1 + $0x4d0] sm:$0xff]  ;;  %v2005_v9 = vpack.c.bf16 %v3177_v52, %v3172_v51  ;;  %v2007_v32 = vpack.c.bf16 %v3187_v61, %v3182_v18  ;;  %v2009_v43 = vpack.c.bf16 %v3203_v13, %v3198_v11 }
  0x63   :  { %2004 = vmatprep.subr.bf16.mxu1 %v2003_v33  ;;  %v327_v58 = vrot.slane %v326_v46, 2  ;;  %v534_v48 = vadd.f32 %v533_v17, %v532_v2  ;;  %1976 = vmatprep.subr.bf16.mxu0 %v1975_v7  ;;  %v3295_v6 = vld [vmem:[%s4276_s1 + $0x540] sm:$0xff]  ;;  %v3300_v21 = vld [vmem:[%s4276_s1 + $0x548] sm:$0xff]  ;;  %v3310_v59 = vld [vmem:[%s4276_s1 + $0x4d8] sm:$0xff]  ;;  %v2011_v2 = vpack.c.bf16 %v3213_v31, %v3208_v14  ;;  %v1987_v52 = vpack.c.bf16 %v3270_v45, %v3265_v28 }
  0x64   :  { %v551_v36 = vadd.f32 %v550_v57, %v549_v5  ;;  %v24_v60 = vld [vmem:[%s4275_s0 + $0x48] sm:$0xff]  ;;  %v3325_v33 = vld [vmem:[%s4276_s1 + $0x450] sm:$0xff]  ;;  %v3330_v12 = vld [vmem:[%s4276_s1 + $0x458] sm:$0xff]  ;;  %v2013_v5 = vpack.c.bf16 %v3223_v38, %v3218_v30  ;;  %v1985_v57 = vpack.c.bf16 %v3240_v54, %v3235_v39  ;;  %v1989_v18 = vpack.c.bf16 %v3280_v35, %v3275_v24 }
  0x65   :  { %v328_v25 = vadd.f32 %v327_v58, %v326_v46  ;;  %v535_v20 = vrot.slane %v534_v48, 2  ;;  %v40_v1 = vld [vmem:[%s4275_s0 + $0xc8] sm:$0xff]  ;;  %v3344_v7 = vld [vmem:[%s4276_s1 + $0x5d0] sm:$0xff]  ;;  %v3349_v8 = vld [vmem:[%s4276_s1 + $0x5d8] sm:$0xff]  ;;  %v2015_v58 = vpack.c.bf16 %v3250_v63, %v3245_v34  ;;  %v2019_v39 = vpack.c.bf16 %v3290_v55, %v3285_v4 }
  0x66   :  { %v952_v23 = vsel %vm944_vm1, %v551_v36, %v343_v56  ;;  %1978 = vmatpush3.bf16.msra.mxu0 %v1977_v50  ;;  %v56_v22 = vld [vmem:[%s4275_s0 + $0x148] sm:$0xff]  ;;  %v3354_v42 = vld [vmem:[%s4276_s1 + $0x550] sm:$0xff]  ;;  %v3359_v37 = vld [vmem:[%s4276_s1 + $0x558] sm:$0xff]  ;;  %v357_v3 = vadd.f32 %v40_v1, %v24_v60  ;;  %v1993_v35 = vpack.c.bf16 %v3330_v12, %v3325_v33 }
  0x67   :  { %1251 = vmatprep.mubr.f32.mxu1 %v952_v23  ;;  %v329_v44 = vrot.slane %v328_v25, 1  ;;  %v536_v15 = vadd.f32 %v535_v20, %v534_v48  ;;  %1980 = vmatprep.subr.bf16.mxu0 %v1979_v62  ;;  %v3364_v46 = vld [vmem:[%s4276_s1 + $0x4e0] sm:$0xff]  ;;  %v3369_v17 = vld [vmem:[%s4276_s1 + $0x4e8] sm:$0xff]  ;;  %v2017_v48 = vpack.c.bf16 %v3260_v19, %v3255_v0  ;;  %v58_v11 = vld [vmem:[%s4275_s0 + $0x158] sm:$0xff] }
  0x68   :  { %v136_v10 = vld [vmem:[%s4275_s0 + $0x3c8] sm:$0xff]  ;;  %v3396_v61 = vld [vmem:[%s4276_s1 + $0x460] sm:$0xff]  ;;  %v358_v49 = vadd.f32 %v357_v3, %v56_v22  ;;  %v138_v14 = vld [vmem:[%s4275_s0 + $0x3d8] sm:$0xff] }
  0x69   :  { %v330_v40 = vadd.f32 %v329_v44, %v328_v25  ;;  %v537_v47 = vrot.slane %v536_v15, 1  ;;  %v72_v50 = vld [vmem:[%s4275_s0 + $0x1c8] sm:$0xff]  ;;  %v3406_v26 = vld [vmem:[%s4276_s1 + $0x5e0] sm:$0xff]  ;;  %v1991_v44 = vpack.c.bf16 %v3310_v59, %v3305_v41  ;;  %v3455_v41 = vld [vmem:[%s4276_s1 + $0x4f8] sm:$0xff] }
  0x6a   :  { %1982 = vmatpush3.bf16.msra.mxu0 %v1981_v16  ;;  %v152_v36 = vld [vmem:[%s4275_s0 + $0x448] sm:$0xff]  ;;  %v23_v28 = vld [vmem:[%s4275_s0 + $0x40] sm:$0xff]  ;;  %v41_v34 = vld [vmem:[%s4275_s0 + $0xd0] sm:$0xff] }
  0x6b   :  { %v538_v56 = vadd.f32 %v537_v47, %v536_v15  ;;  %v168_v51 = vld [vmem:[%s4275_s0 + $0x4c8] sm:$0xff]  ;;  %1984 = vmatprep.subr.bf16.mxu0 %v1983_v29  ;;  %v565_v53 = vadd.f32 %v152_v36, %v136_v10  ;;  %v3429_v15 = vld [vmem:[%s4276_s1 + $0x560] sm:$0xff]  ;;  %v3450_v29 = vld [vmem:[%s4276_s1 + $0x4f0] sm:$0xff] }
  0x6c   :  { %v3401_v62 = vld [vmem:[%s4276_s1 + $0x468] sm:$0xff]  ;;  %v39_v45 = vld [vmem:[%s4275_s0 + $0xc0] sm:$0xff] }
  0x6d   :  { %v3411_v27 = vld [vmem:[%s4276_s1 + $0x5e8] sm:$0xff]  ;;  %v951_v23 = vsel %vm944_vm1, %v538_v56, %v330_v40  ;;  %v55_v24 = vld [vmem:[%s4275_s0 + $0x140] sm:$0xff]  ;;  %v359_v40 = vadd.f32 %v358_v49, %v72_v50  ;;  %v566_v47 = vadd.f32 %v565_v53, %v168_v51  ;;  %v344_v22 = vadd.f32 %v39_v45, %v23_v28  ;;  %v3489_v51 = vld [vmem:[%s4276_s1 + $0x478] sm:$0xff] }
  0x6e   :  { %v88_v25 = vld [vmem:[%s4275_s0 + $0x248] sm:$0xff]  ;;  %1252 = vmatmul.mubr.f32.vlgmr.msra.gmra.mrb[2].mxu1 %v951_v23  ;;  %1986 = vmatpush3.bf16.msra.mxu0 %v1985_v57  ;;  %v1995_v56 = vpack.c.bf16 %v3369_v17, %v3364_v46  ;;  %v71_v36 = vld [vmem:[%s4275_s0 + $0x1c0] sm:$0xff]  ;;  %v3484_v57 = vld [vmem:[%s4276_s1 + $0x470] sm:$0xff]  ;;  %v1997_v28 = vpack.c.bf16 %v3401_v62, %v3396_v61 }
  0x6f   :  { %v184_v20 = vld [vmem:[%s4275_s0 + $0x548] sm:$0xff]  ;;  %2006 = vmatpush3.bf16.msra.mxu1 %v2005_v9  ;;  %v135_v50 = vld [vmem:[%s4275_s0 + $0x3c0] sm:$0xff]  ;;  %1988 = vmatprep.subr.bf16.mxu0 %v1987_v52  ;;  %v360_v53 = vadd.f32 %v359_v40, %v88_v25  ;;  %v345_v52 = vadd.f32 %v344_v22, %v55_v24  ;;  %v42_v40 = vld [vmem:[%s4275_s0 + $0xd8] sm:$0xff]  ;;  %v2001_v31 = vpack.c.bf16 %v3489_v51, %v3484_v57 }
  0x70   :  { %v3434_v16 = vld [vmem:[%s4276_s1 + $0x568] sm:$0xff]  ;;  %v151_v9 = vld [vmem:[%s4275_s0 + $0x440] sm:$0xff]  ;;  %2008 = vmatprep.subr.bf16.mxu1 %v2007_v32  ;;  %v567_v23 = vadd.f32 %v566_v47, %v184_v20  ;;  %v3516_v47 = vld [vmem:[%s4276_s1 + $0x5f0] sm:$0xff] }
  0x71   :  { %v104_v59 = vld [vmem:[%s4275_s0 + $0x2c8] sm:$0xff]  ;;  %v167_v32 = vld [vmem:[%s4275_s0 + $0x4c0] sm:$0xff]  ;;  %v552_v24 = vadd.f32 %v151_v9, %v135_v50  ;;  %v346_v50 = vadd.f32 %v345_v52, %v71_v36  ;;  %v26_v9 = vld [vmem:[%s4275_s0 + $0x58] sm:$0xff] }
  0x72   :  { %v120_v60 = vld [vmem:[%s4275_s0 + $0x348] sm:$0x1]  ;;  %v87_v25 = vld [vmem:[%s4275_s0 + $0x240] sm:$0xff]  ;;  %v361_v22 = vadd.f32 %v360_v53, %v104_v59  ;;  %1990 = vmatpush3.bf16.msra.mxu0 %v1989_v18  ;;  %v1999_v59 = vpack.c.bf16 %v3455_v41, %v3450_v29  ;;  %v383_v13 = vadd.f32 %v42_v40, %v26_v9  ;;  %v122_v9 = vld [vmem:[%s4275_s0 + $0x358] sm:$0x1] }
  0x73   :  { %v200_v1 = vld [vmem:[%s4275_s0 + $0x5c8] sm:$0xff]  ;;  %v362_v10 = vsel %vm244_vm0, %v120_v60, 0.0  ;;  %v119_v20 = vld [vmem:[%s4275_s0 + $0x340] sm:$0x1]  ;;  %v3521_v60 = vld [vmem:[%s4276_s1 + $0x5f8] sm:$0xff]  ;;  %2010 = vmatpush3.bf16.msra.mxu1 %v2009_v43  ;;  %1992 = vmatprep.subr.bf16.mxu0 %v1991_v44  ;;  %v347_v52 = vadd.f32 %v346_v50, %v87_v25 }
  0x74   :  { %v232_v49 = vld [vmem:[%s4275_s0 + $0x6c8] sm:$0x1]  ;;  %v568_v45 = vadd.f32 %v567_v23, %v200_v1  ;;  %v183_v54 = vld [vmem:[%s4275_s0 + $0x540] sm:$0xff]  ;;  %v553_v23 = vadd.f32 %v552_v24, %v167_v32  ;;  %2012 = vmatprep.subr.bf16.mxu1 %v2011_v2  ;;  %v363_v43 = vadd.f32 %v362_v10, %v361_v22  ;;  %v74_v24 = vld [vmem:[%s4275_s0 + $0x1d8] sm:$0xff]  ;;  %v349_v2 = vsel %vm244_vm0, %v119_v20, 0.0 }
  0x75   :  { %v216_v3 = vld [vmem:[%s4275_s0 + $0x648] sm:$0xff]  ;;  %v570_v1 = vsel %vm244_vm0, %v232_v49, 0.0  ;;  %v103_v36 = vld [vmem:[%s4275_s0 + $0x2c0] sm:$0xff]  ;;  %v384_v25 = vadd.f32 %v383_v13, %v58_v11  ;;  %v90_v20 = vld [vmem:[%s4275_s0 + $0x258] sm:$0xff] }
  0x76   :  { %v199_v53 = vld [vmem:[%s4275_s0 + $0x5c0] sm:$0xff]  ;;  %v569_v18 = vadd.f32 %v568_v45, %v216_v3  ;;  %v554_v44 = vadd.f32 %v553_v23, %v183_v54  ;;  %v154_v3 = vld [vmem:[%s4275_s0 + $0x458] sm:$0xff]  ;;  %v364_v40 = vrot.slane %v363_v43, 4  ;;  %v348_v50 = vadd.f32 %v347_v52, %v103_v36  ;;  %v3579_v54 = vld [vmem:[%s4276_s1 + $0x688] sm:$0xff]  ;;  %1994 = vmatpush3.bf16.msra.mxu0 %v1993_v35 }
  0x77   :  { %v215_v49 = vld [vmem:[%s4275_s0 + $0x640] sm:$0xff]  ;;  %v170_v45 = vld [vmem:[%s4275_s0 + $0x4d8] sm:$0xff]  ;;  %v591_v23 = vadd.f32 %v154_v3, %v138_v14  ;;  %2014 = vmatpush3.bf16.msra.mxu1 %v2013_v5  ;;  %v385_v30 = vadd.f32 %v384_v25, %v74_v24  ;;  %1996 = vmatprep.subr.bf16.mxu0 %v1995_v56  ;;  %v388_v56 = vsel %vm244_vm0, %v122_v9, 0.0  ;;  %v57_v14 = vld [vmem:[%s4275_s0 + $0x150] sm:$0xff] }
  0x78   :  { %v231_v32 = vld [vmem:[%s4275_s0 + $0x6c0] sm:$0x1]  ;;  %v571_v22 = vadd.f32 %v570_v1, %v569_v18  ;;  %v2031_v1 = vpack.c.bf16 %v3521_v60, %v3516_v47  ;;  %v555_v36 = vadd.f32 %v554_v44, %v199_v53  ;;  %v106_v13 = vld [vmem:[%s4275_s0 + $0x2d8] sm:$0xff]  ;;  %2016 = vmatprep.subr.bf16.mxu1 %v2015_v58  ;;  %v365_v38 = vadd.f32 %v364_v40, %v363_v43  ;;  %v25_v53 = vld [vmem:[%s4275_s0 + $0x50] sm:$0xff] }
  0x79   :  { %v3568_v10 = vld [vmem:[%s4276_s1 + $0x680] sm:$0xff]  ;;  %v557_v11 = vsel %vm244_vm0, %v231_v32, 0.0  ;;  %v186_v18 = vld [vmem:[%s4275_s0 + $0x558] sm:$0xff]  ;;  %v350_v12 = vadd.f32 %v349_v2, %v348_v50  ;;  %v592_v35 = vadd.f32 %v591_v23, %v170_v45  ;;  %v386_v58 = vadd.f32 %v385_v30, %v90_v20  ;;  %v153_v45 = vld [vmem:[%s4275_s0 + $0x450] sm:$0xff] }
  0x7a   :  { %v572_v33 = vrot.slane %v571_v22, 4  ;;  %v234_v5 = vld [vmem:[%s4275_s0 + $0x6d8] sm:$0x1]  ;;  %v556_v63 = vadd.f32 %v555_v36, %v215_v49  ;;  %v2035_v46 = vpack.c.bf16 %v3579_v54, %v3568_v10  ;;  %v366_v43 = vrot.slane %v365_v38, 2  ;;  %v137_v49 = vld [vmem:[%s4275_s0 + $0x3d0] sm:$0xff]  ;;  %1998 = vmatpush3.bf16.msra.mxu0 %v1997_v28  ;;  %v868_v47 = vld [vmem:[%s4276_s1 + $0x6a0] sm:$0xff] }
  0x7b   :  { %v202_v17 = vld [vmem:[%s4275_s0 + $0x5d8] sm:$0xff]  ;;  %v351_v52 = vrot.slane %v350_v12, 4  ;;  %v593_v24 = vadd.f32 %v592_v35, %v186_v18  ;;  %2018 = vmatpush3.bf16.msra.mxu1 %v2017_v48  ;;  %v387_v10 = vadd.f32 %v386_v58, %v106_v13  ;;  %v596_v3 = vsel %vm244_vm0, %v234_v5, 0.0  ;;  %2000 = vmatprep.subr.bf16.mxu0 %v1999_v59  ;;  %v73_v62 = vld [vmem:[%s4275_s0 + $0x1d0] sm:$0xff]  ;;  %v869_v60 = vld [vmem:[%s4276_s1 + $0x6a8] sm:$0xff] }
  0x7c   :  { %v573_v32 = vadd.f32 %v572_v33, %v571_v22  ;;  %v558_v2 = vadd.f32 %v557_v11, %v556_v63  ;;  %v218_v44 = vld [vmem:[%s4275_s0 + $0x658] sm:$0xff]  ;;  %v370_v25 = vadd.f32 %v41_v34, %v25_v53  ;;  %2020 = vmatprep.subr.bf16.mxu1 %v2019_v39  ;;  %v367_v0 = vadd.f32 %v366_v43, %v365_v38  ;;  %v169_v28 = vld [vmem:[%s4275_s0 + $0x4d0] sm:$0xff] }
  0x7d   :  { %v352_v48 = vadd.f32 %v351_v52, %v350_v12  ;;  %v594_v61 = vadd.f32 %v593_v24, %v202_v17  ;;  %v389_v22 = vadd.f32 %v388_v56, %v387_v10  ;;  %v578_v55 = vadd.f32 %v153_v45, %v137_v49  ;;  %v89_v59 = vld [vmem:[%s4275_s0 + $0x250] sm:$0xff]  ;;  %v831_v58 = vld [vmem:[%s4276_s1 + $0x578] sm:$0xff]  ;;  %v849_v52 = vld [vmem:[%s4276_s1 + $0x608] sm:$0xff] }
  0x7e   :  { %v574_v19 = vrot.slane %v573_v32, 2  ;;  %v559_v40 = vrot.slane %v558_v2, 4  ;;  %v371_v4 = vadd.f32 %v370_v25, %v57_v14  ;;  %v368_v39 = vrot.slane %v367_v0, 1  ;;  %v185_v54 = vld [vmem:[%s4275_s0 + $0x550] sm:$0xff]  ;;  %2002 = vmatpush3.bf16.msra.mxu0 %v2001_v31  ;;  %v897_v25 = vld [vmem:[%s4276_s1 + $0x788] sm:$0xff] }
  0x7f   :  { %v353_v29 = vrot.slane %v352_v48, 2  ;;  %v595_v41 = vadd.f32 %v594_v61, %v218_v44  ;;  %v4292_v20 = vpack.c.bf16 %v3300_v21, %v3295_v6  ;;  %v390_v23 = vrot.slane %v389_v22, 4  ;;  %v121_v36 = vld [vmem:[%s4275_s0 + $0x350] sm:$0x1]  ;;  %2036 = vmatprep.subr.bf16.mxu0 %v2035_v46  ;;  %v896_v44 = vld [vmem:[%s4276_s1 + $0x780] sm:$0xff] }
  0x80   :  { %v575_v50 = vadd.f32 %v574_v19, %v573_v32  ;;  %v560_v9 = vadd.f32 %v559_v40, %v558_v2  ;;  %v372_v11 = vadd.f32 %v371_v4, %v73_v62  ;;  %v579_v13 = vadd.f32 %v578_v55, %v169_v28  ;;  %v105_v57 = vld [vmem:[%s4275_s0 + $0x2d0] sm:$0xff]  ;;  %v848_v32 = vld [vmem:[%s4276_s1 + $0x600] sm:$0xff]  ;;  %v867_v19 = vld [vmem:[%s4276_s1 + $0x698] sm:$0xff] }
  0x81   :  { %2022 = vmatpush3.bf16.msra.mxu1 %v4292_v20  ;;  %v4293_v18 = vpack.c.bf16 %v3349_v8, %v3344_v7  ;;  %v369_v30 = vadd.f32 %v368_v39, %v367_v0  ;;  %v354_v6 = vadd.f32 %v353_v29, %v352_v48  ;;  %v597_v21 = vadd.f32 %v596_v3, %v595_v41  ;;  %v201_v51 = vld [vmem:[%s4275_s0 + $0x5d0] sm:$0xff] }
  0x82   :  { %v576_v38 = vrot.slane %v575_v50, 1  ;;  %v561_v31 = vrot.slane %v560_v9, 2  ;;  %v391_v33 = vadd.f32 %v390_v23, %v389_v22  ;;  %v233_v7 = vld [vmem:[%s4275_s0 + $0x6d0] sm:$0x1]  ;;  %v373_v8 = vadd.f32 %v372_v11, %v89_v59  ;;  %v3744_v11 = vld [vmem:[%s4276_s1 + $0x708] sm:$0xff] }
  0x83   :  { %2024 = vmatprep.subr.bf16.mxu1 %v4293_v18  ;;  %v580_v12 = vadd.f32 %v579_v13, %v185_v54  ;;  %v830_v5 = vld [vmem:[%s4276_s1 + $0x570] sm:$0xff]  ;;  %v355_v53 = vrot.slane %v354_v6, 1  ;;  %v598_v34 = vrot.slane %v597_v21, 4  ;;  %v375_v46 = vsel %vm244_vm0, %v121_v36, 0.0  ;;  %v3739_v36 = vld [vmem:[%s4276_s1 + $0x700] sm:$0xff] }
  0x84   :  { %v577_v35 = vadd.f32 %v576_v38, %v575_v50  ;;  %v217_v63 = vld [vmem:[%s4275_s0 + $0x650] sm:$0xff]  ;;  %v4294_v17 = vpack.c.bf16 %v3359_v37, %v3354_v42  ;;  %v562_v56 = vadd.f32 %v561_v31, %v560_v9  ;;  %v392_v43 = vrot.slane %v391_v33, 2  ;;  %v3754_v38 = vld [vmem:[%s4276_s1 + $0x798] sm:$0xff]  ;;  %v853_v31 = vld [vmem:[%s4276_s1 + $0x628] sm:$0xff] }
  0x85   :  { %v374_v24 = vadd.f32 %v373_v8, %v105_v57  ;;  %v581_v14 = vadd.f32 %v580_v12, %v201_v51  ;;  %v4295_v42 = vpack.c.bf16 %v3411_v27, %v3406_v26  ;;  %v356_v49 = vadd.f32 %v355_v53, %v354_v6  ;;  %v866_v27 = vld [vmem:[%s4276_s1 + $0x690] sm:$0xff]  ;;  %v852_v51 = vld [vmem:[%s4276_s1 + $0x620] sm:$0xff]  ;;  %v3795_v53 = vld [vmem:[%s4276_s1 + $0x728] sm:$0xff] }
  0x86   :  { %2026 = vmatpush3.bf16.msra.mxu1 %v4294_v17  ;;  %v954_v37 = vsel %vm944_vm1, %v577_v35, %v369_v30  ;;  %v599_v2 = vadd.f32 %v598_v34, %v597_v21  ;;  %v583_v10 = vsel %vm244_vm0, %v233_v7, 0.0  ;;  %v563_v3 = vrot.slane %v562_v56, 1  ;;  %v850_v41 = vld [vmem:[%s4276_s1 + $0x610] sm:$0xff]  ;;  %v3764_v21 = vld [vmem:[%s4276_s1 + $0x718] sm:$0xff]  ;;  %v3780_v12 = vld [vmem:[%s4276_s1 + $0x7a0] sm:$0xff] }
  0x87   :  { %2028 = vmatprep.subr.bf16.mxu1 %v4295_v42  ;;  %1321 = vmatprep.mubr.f32.mxu0 %v954_v37  ;;  %v393_v45 = vadd.f32 %v392_v43, %v391_v33  ;;  %v376_v0 = vadd.f32 %v375_v46, %v374_v24  ;;  %v582_v26 = vadd.f32 %v581_v14, %v217_v63  ;;  %v3749_v30 = vld [vmem:[%s4276_s1 + $0x790] sm:$0xff]  ;;  %v3790_v35 = vld [vmem:[%s4276_s1 + $0x720] sm:$0xff]  ;;  %v871_v34 = vld [vmem:[%s4276_s1 + $0x6b8] sm:$0xff] }
  0x88   :  { %v2033_v48 = vpack.c.bf16 %v831_v58, %v830_v5  ;;  %v600_v61 = vrot.slane %v599_v2, 2  ;;  %v2037_v62 = vpack.c.bf16 %v849_v52, %v848_v32  ;;  %v4296_v28 = vpack.c.bf16 %v3434_v16, %v3429_v15  ;;  %v851_v15 = vld [vmem:[%s4276_s1 + $0x618] sm:$0xff]  ;;  %v3759_v6 = vld [vmem:[%s4276_s1 + $0x710] sm:$0xff]  ;;  %v3785_v5 = vld [vmem:[%s4276_s1 + $0x7a8] sm:$0xff] }
  0x89   :  { %v564_v40 = vadd.f32 %v563_v3, %v562_v56  ;;  %v394_v22 = vrot.slane %v393_v45, 1  ;;  %v377_v4 = vrot.slane %v376_v0, 4  ;;  %v584_v55 = vadd.f32 %v583_v10, %v582_v26  ;;  %v3775_v33 = vld [vmem:[%s4276_s1 + $0x6b0] sm:$0xff]  ;;  %v3808_v46 = vld [vmem:[%s4276_s1 + $0x638] sm:$0xff]  ;;  %v3834_v52 = vld [vmem:[%s4276_s1 + $0x6c0] sm:$0xff] }
  0x8a   :  { %2030 = vmatpush3.bf16.msra.mxu1 %v4296_v28  ;;  %v601_v39 = vadd.f32 %v600_v61, %v599_v2  ;;  %v2067_v50 = vpack.c.bf16 %v897_v25, %v896_v44  ;;  %v2039_v29 = vpack.c.bf16 %v867_v19, %v866_v27  ;;  %v2041_v13 = vpack.c.bf16 %v851_v15, %v850_v41  ;;  %v3803_v63 = vld [vmem:[%s4276_s1 + $0x630] sm:$0xff]  ;;  %v3819_v56 = vld [vmem:[%s4276_s1 + $0x7b8] sm:$0xff]  ;;  %v3839_v24 = vld [vmem:[%s4276_s1 + $0x6c8] sm:$0xff] }
  0x8b   :  { %2032 = vmatprep.subr.bf16.mxu1 %v2031_v1  ;;  %v953_v16 = vsel %vm944_vm1, %v564_v40, %v356_v49  ;;  %v378_v59 = vadd.f32 %v377_v4, %v376_v0  ;;  %v585_v54 = vrot.slane %v584_v55, 4  ;;  %v395_v1 = vadd.f32 %v394_v22, %v393_v45  ;;  %v3814_v58 = vld [vmem:[%s4276_s1 + $0x7b0] sm:$0xff]  ;;  %v3829_v32 = vld [vmem:[%s4276_s1 + $0x738] sm:$0xff]  ;;  %v3844_v49 = vld [vmem:[%s4276_s1 + $0x640] sm:$0xff] }
  0x8c   :  { %1322 = vmatmul.mubr.f32.vlgmr.msra.gmra.mrb[4].mxu0 %v953_v16  ;;  %v602_v20 = vrot.slane %v601_v39, 1  ;;  %v2043_v57 = vpack.c.bf16 %v869_v60, %v868_v47  ;;  %v3824_v43 = vld [vmem:[%s4276_s1 + $0x730] sm:$0xff]  ;;  %v2045_v37 = vpack.c.bf16 %v853_v31, %v852_v51  ;;  %v3849_v2 = vld [vmem:[%s4276_s1 + $0x648] sm:$0xff]  ;;  %v3854_v44 = vld [vmem:[%s4276_s1 + $0x7c0] sm:$0xff]  ;;  %v2069_v3 = vpack.c.bf16 %v3744_v11, %v3739_v36 }
  0x8d   :  { %2038 = vmatpush3.bf16.msra.mxu0 %v2037_v62  ;;  %v379_v9 = vrot.slane %v378_v59, 2  ;;  %v586_v23 = vadd.f32 %v585_v54, %v584_v55  ;;  %v3859_v10 = vld [vmem:[%s4276_s1 + $0x7c8] sm:$0xff]  ;;  %v2047_v45 = vpack.c.bf16 %v871_v34, %v3775_v33  ;;  %v3867_v25 = vld [vmem:[%s4276_s1 + $0x740] sm:$0xff]  ;;  %v3877_v26 = vld [vmem:[%s4276_s1 + $0x6d0] sm:$0xff]  ;;  %v2071_v22 = vpack.c.bf16 %v3754_v38, %v3749_v30 }
  0x8e   :  { %2034 = vmatpush3.bf16.msra.mxu1 %v2033_v48  ;;  %v603_v18 = vadd.f32 %v602_v20, %v601_v39  ;;  %2040 = vmatprep.subr.bf16.mxu0 %v2039_v29  ;;  %v3872_v0 = vld [vmem:[%s4276_s1 + $0x748] sm:$0xff]  ;;  %v3882_v27 = vld [vmem:[%s4276_s1 + $0x6d8] sm:$0xff]  ;;  %v3887_v19 = vld [vmem:[%s4276_s1 + $0x650] sm:$0xff]  ;;  %v2073_v4 = vpack.c.bf16 %v3764_v21, %v3759_v6  ;;  %v2075_v29 = vpack.c.bf16 %v3785_v5, %v3780_v12 }
  0x8f   :  { %2068 = vmatprep.subr.bf16.mxu1 %v2067_v50  ;;  %v380_v7 = vadd.f32 %v379_v9, %v378_v59  ;;  %v587_v8 = vrot.slane %v586_v23, 2  ;;  %v3892_v48 = vld [vmem:[%s4276_s1 + $0x658] sm:$0xff]  ;;  %v28_v61 = vld [vmem:[%s4275_s0 + $0x68] sm:$0xff]  ;;  %v3907_v55 = vld [vmem:[%s4276_s1 + $0x7d0] sm:$0xff]  ;;  %v2077_v41 = vpack.c.bf16 %v3795_v53, %v3790_v35  ;;  %v2049_v15 = vpack.c.bf16 %v3808_v46, %v3803_v63 }
  0x90   :  { %v956_v17 = vsel %vm944_vm1, %v603_v18, %v395_v1  ;;  %v44_v62 = vld [vmem:[%s4275_s0 + $0xe8] sm:$0xff]  ;;  %v3912_v39 = vld [vmem:[%s4276_s1 + $0x7d8] sm:$0xff]  ;;  %v3926_v16 = vld [vmem:[%s4276_s1 + $0x750] sm:$0xff]  ;;  %v2051_v30 = vpack.c.bf16 %v3839_v24, %v3834_v52  ;;  %v2053_v31 = vpack.c.bf16 %v3849_v2, %v3844_v49  ;;  %v2057_v49 = vpack.c.bf16 %v3892_v48, %v3887_v19 }
  0x91   :  { %1391 = vmatprep.mubr.f32.mxu1 %v956_v17  ;;  %v381_v14 = vrot.slane %v380_v7, 1  ;;  %v588_v42 = vadd.f32 %v587_v8, %v586_v23  ;;  %2042 = vmatpush3.bf16.msra.mxu0 %v2041_v13  ;;  %v60_v50 = vld [vmem:[%s4275_s0 + $0x168] sm:$0xff]  ;;  %v3931_v59 = vld [vmem:[%s4276_s1 + $0x758] sm:$0xff]  ;;  %v3936_v54 = vld [vmem:[%s4276_s1 + $0x6e0] sm:$0xff]  ;;  %v409_v9 = vadd.f32 %v44_v62, %v28_v61  ;;  %v2079_v13 = vpack.c.bf16 %v3819_v56, %v3814_v58 }
  0x92   :  { %2044 = vmatprep.subr.bf16.mxu0 %v2043_v57  ;;  %v3941_v47 = vld [vmem:[%s4276_s1 + $0x6e8] sm:$0xff]  ;;  %v3946_v60 = vld [vmem:[%s4276_s1 + $0x660] sm:$0xff]  ;;  %v4011_v2 = vld [vmem:[%s4276_s1 + $0x6f0] sm:$0xff] }
  0x93   :  { %v382_v28 = vadd.f32 %v381_v14, %v380_v7  ;;  %v589_v40 = vrot.slane %v588_v42, 1  ;;  %v3951_v1 = vld [vmem:[%s4276_s1 + $0x668] sm:$0xff]  ;;  %v3978_v7 = vld [vmem:[%s4276_s1 + $0x7e0] sm:$0xff]  ;;  %v410_v52 = vadd.f32 %v409_v9, %v60_v50  ;;  %v46_v18 = vld [vmem:[%s4275_s0 + $0xf8] sm:$0xff] }
  0x94   :  { %v140_v20 = vld [vmem:[%s4275_s0 + $0x3e8] sm:$0xff]  ;;  %v3988_v34 = vld [vmem:[%s4276_s1 + $0x760] sm:$0xff]  ;;  %v126_v6 = vld [vmem:[%s4275_s0 + $0x378] sm:$0x1] }
  0x95   :  { %v590_v23 = vadd.f32 %v589_v40, %v588_v42  ;;  %2046 = vmatpush3.bf16.msra.mxu0 %v2045_v37  ;;  %v76_v38 = vld [vmem:[%s4275_s0 + $0x1e8] sm:$0xff]  ;;  %v2055_v37 = vpack.c.bf16 %v3882_v27, %v3877_v26  ;;  %v27_v61 = vld [vmem:[%s4275_s0 + $0x60] sm:$0xff]  ;;  %v4037_v40 = vld [vmem:[%s4276_s1 + $0x678] sm:$0xff]  ;;  %v2059_v42 = vpack.c.bf16 %v3941_v47, %v3936_v54 }
  0x96   :  { %v156_v57 = vld [vmem:[%s4275_s0 + $0x468] sm:$0xff]  ;;  %2048 = vmatprep.subr.bf16.mxu0 %v2047_v45  ;;  %v4016_v45 = vld [vmem:[%s4276_s1 + $0x6f8] sm:$0xff]  ;;  %v43_v26 = vld [vmem:[%s4275_s0 + $0xe0] sm:$0xff] }
  0x97   :  { %v172_v51 = vld [vmem:[%s4275_s0 + $0x4e8] sm:$0xff]  ;;  %v617_v24 = vadd.f32 %v156_v57, %v140_v20  ;;  %v955_v14 = vsel %vm944_vm1, %v590_v23, %v382_v28  ;;  %v59_v27 = vld [vmem:[%s4275_s0 + $0x160] sm:$0xff]  ;;  %v4032_v28 = vld [vmem:[%s4276_s1 + $0x670] sm:$0xff]  ;;  %v411_v23 = vadd.f32 %v410_v52, %v76_v38 }
  0x98   :  { %v3983_v8 = vld [vmem:[%s4276_s1 + $0x7e8] sm:$0xff]  ;;  %1392 = vmatmul.mubr.f32.vlgmr.msra.gmra.mrb[4].mxu1 %v955_v14  ;;  %v396_v14 = vadd.f32 %v43_v26, %v27_v61  ;;  %v139_v36 = vld [vmem:[%s4275_s0 + $0x3e0] sm:$0xff]  ;;  %v110_v48 = vld [vmem:[%s4275_s0 + $0x2f8] sm:$0xff] }
  0x99   :  { %v3993_v63 = vld [vmem:[%s4276_s1 + $0x768] sm:$0xff]  ;;  %v618_v57 = vadd.f32 %v617_v24, %v172_v51  ;;  %2070 = vmatpush3.bf16.msra.mxu1 %v2069_v3  ;;  %2050 = vmatpush3.bf16.msra.mxu0 %v2049_v15  ;;  %v75_v51 = vld [vmem:[%s4275_s0 + $0x1e0] sm:$0xff]  ;;  %v125_v58 = vld [vmem:[%s4275_s0 + $0x370] sm:$0x1] }
  0x9a   :  { %v92_v46 = vld [vmem:[%s4275_s0 + $0x268] sm:$0xff]  ;;  %v155_v11 = vld [vmem:[%s4275_s0 + $0x460] sm:$0xff]  ;;  %2072 = vmatprep.subr.bf16.mxu1 %v2071_v22  ;;  %2052 = vmatprep.subr.bf16.mxu0 %v2051_v30  ;;  %v397_v26 = vadd.f32 %v396_v14, %v59_v27 }
  0x9b   :  { %v188_v17 = vld [vmem:[%s4275_s0 + $0x568] sm:$0xff]  ;;  %v412_v15 = vadd.f32 %v411_v23, %v92_v46  ;;  %v91_v24 = vld [vmem:[%s4275_s0 + $0x260] sm:$0xff]  ;;  %v604_v23 = vadd.f32 %v155_v11, %v139_v36  ;;  %v62_v36 = vld [vmem:[%s4275_s0 + $0x178] sm:$0xff] }
  0x9c   :  { %v108_v50 = vld [vmem:[%s4275_s0 + $0x2e8] sm:$0xff]  ;;  %v619_v52 = vadd.f32 %v618_v57, %v188_v17  ;;  %v171_v61 = vld [vmem:[%s4275_s0 + $0x4e0] sm:$0xff]  ;;  %v30_v57 = vld [vmem:[%s4275_s0 + $0x78] sm:$0xff]  ;;  %v398_v33 = vadd.f32 %v397_v26, %v75_v51 }
  0x9d   :  { %v124_v20 = vld [vmem:[%s4275_s0 + $0x368] sm:$0x1]  ;;  %v107_v46 = vld [vmem:[%s4275_s0 + $0x2e0] sm:$0xff]  ;;  %v413_v14 = vadd.f32 %v412_v15, %v108_v50  ;;  %2074 = vmatpush3.bf16.msra.mxu1 %v2073_v4  ;;  %2054 = vmatpush3.bf16.msra.mxu0 %v2053_v31  ;;  %v2065_v50 = vpack.c.bf16 %v4037_v40, %v4032_v28  ;;  %v605_v11 = vadd.f32 %v604_v23, %v171_v61  ;;  %v78_v15 = vld [vmem:[%s4275_s0 + $0x1f8] sm:$0xff] }
  0x9e   :  { %v204_v9 = vld [vmem:[%s4275_s0 + $0x5e8] sm:$0xff]  ;;  %v414_v30 = vsel %vm244_vm0, %v124_v20, 0.0  ;;  %v123_v17 = vld [vmem:[%s4275_s0 + $0x360] sm:$0x1]  ;;  %v2063_v20 = vpack.c.bf16 %v4016_v45, %v4011_v2  ;;  %v435_v21 = vadd.f32 %v46_v18, %v30_v57  ;;  %2076 = vmatprep.subr.bf16.mxu1 %v2075_v29  ;;  %2056 = vmatprep.subr.bf16.mxu0 %v2055_v37  ;;  %v158_v61 = vld [vmem:[%s4275_s0 + $0x478] sm:$0xff] }
  0x9f   :  { %v220_v38 = vld [vmem:[%s4275_s0 + $0x668] sm:$0xff]  ;;  %v187_v27 = vld [vmem:[%s4275_s0 + $0x560] sm:$0xff]  ;;  %v620_v22 = vadd.f32 %v619_v52, %v204_v9  ;;  %v415_v4 = vadd.f32 %v414_v30, %v413_v14  ;;  %v142_v52 = vld [vmem:[%s4275_s0 + $0x3f8] sm:$0xff]  ;;  %v401_v5 = vsel %vm244_vm0, %v123_v17, 0.0 }
  0xa0   :  { %v236_v3 = vld [vmem:[%s4275_s0 + $0x6e8] sm:$0x1]  ;;  %v203_v62 = vld [vmem:[%s4275_s0 + $0x5e0] sm:$0xff]  ;;  %v174_v18 = vld [vmem:[%s4275_s0 + $0x4f8] sm:$0xff]  ;;  %v606_v29 = vadd.f32 %v605_v11, %v187_v27 }
  0xa1   :  { %v622_v9 = vsel %vm244_vm0, %v236_v3, 0.0  ;;  %v235_v51 = vld [vmem:[%s4275_s0 + $0x6e0] sm:$0x1]  ;;  %v621_v31 = vadd.f32 %v620_v22, %v220_v38  ;;  %v399_v3 = vadd.f32 %v398_v33, %v91_v24  ;;  %v94_v33 = vld [vmem:[%s4275_s0 + $0x278] sm:$0xff]  ;;  %v436_v38 = vadd.f32 %v435_v21, %v62_v36  ;;  %v29_v27 = vld [vmem:[%s4275_s0 + $0x70] sm:$0xff]  ;;  %2078 = vmatpush3.bf16.msra.mxu1 %v2077_v41  ;;  %2058 = vmatpush3.bf16.msra.mxu0 %v2057_v49 }
  0xa2   :  { %v219_v12 = vld [vmem:[%s4275_s0 + $0x660] sm:$0xff]  ;;  %v190_v37 = vld [vmem:[%s4275_s0 + $0x578] sm:$0xff]  ;;  %v643_v24 = vadd.f32 %v158_v61, %v142_v52  ;;  %v416_v26 = vrot.slane %v415_v4, 4  ;;  %v609_v23 = vsel %vm244_vm0, %v235_v51, 0.0  ;;  %v45_v57 = vld [vmem:[%s4275_s0 + $0xf0] sm:$0xff]  ;;  %v440_v36 = vsel %vm244_vm0, %v126_v6, 0.0  ;;  %2080 = vmatprep.subr.bf16.mxu1 %v2079_v13  ;;  %2060 = vmatprep.subr.bf16.mxu0 %v2059_v42 }
  0xa3   :  { %v623_v22 = vadd.f32 %v622_v9, %v621_v31  ;;  %v400_v30 = vadd.f32 %v399_v3, %v107_v46  ;;  %v238_v17 = vld [vmem:[%s4275_s0 + $0x6f8] sm:$0x1]  ;;  %v607_v46 = vadd.f32 %v606_v29, %v203_v62  ;;  %v437_v14 = vadd.f32 %v436_v38, %v78_v15  ;;  %v61_v51 = vld [vmem:[%s4275_s0 + $0x170] sm:$0xff] }
  0xa4   :  { %v644_v9 = vadd.f32 %v643_v24, %v174_v18  ;;  %v417_v35 = vadd.f32 %v416_v26, %v415_v4  ;;  %v206_v41 = vld [vmem:[%s4275_s0 + $0x5f8] sm:$0xff]  ;;  %v422_v56 = vadd.f32 %v45_v57, %v29_v27  ;;  %v648_v47 = vsel %vm244_vm0, %v238_v17, 0.0  ;;  %v77_v42 = vld [vmem:[%s4275_s0 + $0x1f0] sm:$0xff] }
  0xa5   :  { %v624_v53 = vrot.slane %v623_v22, 4  ;;  %v402_v19 = vadd.f32 %v401_v5, %v400_v30  ;;  %v608_v13 = vadd.f32 %v607_v46, %v219_v12  ;;  %v438_v49 = vadd.f32 %v437_v14, %v94_v33  ;;  %v222_v6 = vld [vmem:[%s4275_s0 + $0x678] sm:$0xff]  ;;  %v141_v21 = vld [vmem:[%s4275_s0 + $0x3f0] sm:$0xff] }
  0xa6   :  { %v645_v54 = vadd.f32 %v644_v9, %v190_v37  ;;  %v418_v62 = vrot.slane %v417_v35, 2  ;;  %v157_v4 = vld [vmem:[%s4275_s0 + $0x470] sm:$0xff]  ;;  %v423_v31 = vadd.f32 %v422_v56, %v61_v51  ;;  %v4297_v3 = vpack.c.bf16 %v3829_v32, %v3824_v43 }
  0xa7   :  { %v625_v11 = vadd.f32 %v624_v53, %v623_v22  ;;  %v403_v15 = vrot.slane %v402_v19, 4  ;;  %v4298_v52 = vpack.c.bf16 %v3951_v1, %v3946_v60  ;;  %v610_v61 = vadd.f32 %v609_v23, %v608_v13  ;;  %v93_v5 = vld [vmem:[%s4275_s0 + $0x270] sm:$0xff] }
  0xa8   :  { %2082 = vmatpush3.bf16.msra.mxu1 %v4297_v3  ;;  %v439_v18 = vadd.f32 %v438_v49, %v110_v48  ;;  %v646_v12 = vadd.f32 %v645_v54, %v206_v41  ;;  %v427_v29 = vsel %vm244_vm0, %v125_v58, 0.0 }
  0xa9   :  { %2062 = vmatpush3.bf16.msra.mxu0 %v4298_v52 }
  0xaa   :  { %8 = vsyncpa [#allocation3], 0  ;;  %v4299_v33 = vpack.c.bf16 %v3859_v10, %v3854_v44  ;;  %2064 = vmatprep.subr.bf16.mxu0 %v2063_v20  ;;  %v419_v43 = vadd.f32 %v418_v62, %v417_v35  ;;  %v626_v32 = vrot.slane %v625_v11, 2  ;;  %v404_v60 = vadd.f32 %v403_v15, %v402_v19  ;;  %v173_v1 = vld [vmem:[%s4275_s0 + $0x4f0] sm:$0xff]  ;;  %v911_v27 = vld [vmem:[%s4276_s1 + $0x7f8] sm:$0xff]  ;;  %s2124_s27 = smov [#allocation2]  }
  0xab   :  { %v424_v37 = vadd.f32 %v423_v31, %v77_v42  ;;  %v611_v38 = vrot.slane %v610_v61, 4  ;;  %v441_v24 = vadd.f32 %v440_v36, %v439_v18  ;;  %v647_v26 = vadd.f32 %v646_v12, %v222_v6  ;;  %v109_v44 = vld [vmem:[%s4275_s0 + $0x2f0] sm:$0xff]  ;;  %v895_v54 = vld [vmem:[%s4276_s1 + $0x778] sm:$0xff]  ;;  %s1554_s28 = sshll.u32 %s2124_s27, 4  ;;  %s1555_s28 = int_to_ptr.vmem [resolvable:$true] %s1554_s28 }
  0xac   :  { %2084 = vmatprep.subr.bf16.mxu1 %v4299_v33  ;;  %v630_v10 = vadd.f32 %v157_v4, %v141_v21  ;;  %v420_v22 = vrot.slane %v419_v43, 1  ;;  %v627_v30 = vadd.f32 %v626_v32, %v625_v11  ;;  %v405_v2 = vrot.slane %v404_v60, 2  ;;  %v189_v45 = vld [vmem:[%s4275_s0 + $0x570] sm:$0xff]  ;;  %s2100_s29 = scalar_lea.vmem %s1555_s28, 32  ;;  %p2105_p1 = scmp.lt.s32.totalorder %s1555_s28, %s1555_s28 }
  0xad   :  { %v425_v20 = vadd.f32 %v424_v37, %v93_v5  ;;  %v4300_v23 = vpack.c.bf16 %v3872_v0, %v3867_v25  ;;  %2066 = vmatpush3.bf16.msra.mxu0 %v2065_v50  ;;  %v910_v17 = vld [vmem:[%s4276_s1 + $0x7f0] sm:$0xff]  ;;  %v612_v57 = vadd.f32 %v611_v38, %v610_v61  ;;  %v442_v46 = vrot.slane %v441_v24, 4  ;;  %p2101_p0 = scmp.ne.s32.totalorder %s1555_s28, %s2100_s29  ;;  %p2106_p2 = scmp.lt.s32.totalorder %s2100_s29, %s2100_s29 }
  0xae   :  { %v649_v14 = vadd.f32 %v648_v47, %v647_v26  ;;  %v631_v36 = vadd.f32 %v630_v10, %v173_v1  ;;  %v4301_v25 = vpack.c.bf16 %v3912_v39, %v3907_v55  ;;  %v421_v0 = vadd.f32 %v420_v22, %v419_v43  ;;  %v205_v40 = vld [vmem:[%s4275_s0 + $0x5f0] sm:$0xff] }
  0xaf   :  { %2086 = vmatpush3.bf16.msra.mxu1 %v4300_v23  ;;  %v628_v9 = vrot.slane %v627_v30, 1  ;;  %v406_v28 = vadd.f32 %v405_v2, %v404_v60  ;;  %v426_v50 = vadd.f32 %v425_v20, %v109_v44  ;;  %v613_v51 = vrot.slane %v612_v57, 2  ;;  %v237_v19 = vld [vmem:[%s4275_s0 + $0x6f0] sm:$0x1]  ;;  %p2107_p3 = por %p2106_p2, %p2105_p1 }
  0xb0   :  { %2088 = vmatprep.subr.bf16.mxu1 %v4301_v25  ;;  %v443_v35 = vadd.f32 %v442_v46, %v441_v24  ;;  %v650_v53 = vrot.slane %v649_v14, 4  ;;  %v632_v48 = vadd.f32 %v631_v36, %v189_v45  ;;  %v2095_v41 = vpack.c.bf16 %v911_v27, %v910_v17  ;;  %v221_v39 = vld [vmem:[%s4275_s0 + $0x670] sm:$0xff] }
  0xb1   :  { %v629_v58 = vadd.f32 %v628_v9, %v627_v30  ;;  %v407_v55 = vrot.slane %v406_v28, 1  ;;  %v428_v56 = vadd.f32 %v427_v29, %v426_v50  ;;  %v4302_v13 = vpack.c.bf16 %v3931_v59, %v3926_v16  ;;  %v894_v49 = vld [vmem:[%s4276_s1 + $0x770] sm:$0xff]  ;;  %p2108_p4 = pnand %p2107_p3, %p2101_p0 }
  0xb2   :  { %v614_v47 = vadd.f32 %v613_v51, %v612_v57  ;;  %v444_v42 = vrot.slane %v443_v35, 2  ;;  %v651_v62 = vadd.f32 %v650_v53, %v649_v14  ;;  %v633_v11 = vadd.f32 %v632_v48, %v205_v40 }
  0xb3   :  { %2090 = vmatpush3.bf16.msra.mxu1 %v4302_v13  ;;  %v4303_v15 = vpack.c.bf16 %v3983_v8, %v3978_v7  ;;  %v958_v6 = vsel %vm944_vm1, %v629_v58, %v421_v0  ;;  %v408_v16 = vadd.f32 %v407_v55, %v406_v28  ;;  %v429_v59 = vrot.slane %v428_v56, 4 }
  0xb4   :  { %v635_v21 = vsel %vm244_vm0, %v237_v19, 0.0  ;;  %1461 = vmatprep.mubr.f32.mxu0 %v958_v6  ;;  %v615_v4 = vrot.slane %v614_v47, 1  ;;  %v445_v31 = vadd.f32 %v444_v42, %v443_v35  ;;  %v652_v3 = vrot.slane %v651_v62, 2 }
  0xb5   :  { %2092 = vmatprep.subr.bf16.mxu1 %v4303_v15  ;;  %v634_v52 = vadd.f32 %v633_v11, %v221_v39  ;;  %v2097_v61 = vpack.c.bf16 %v895_v54, %v894_v49  ;;  %v430_v18 = vadd.f32 %v429_v59, %v428_v56  ;;  %v4304_v12 = vpack.c.bf16 %v3993_v63, %v3988_v34  ;;  %v1562_v11 = vld [vmem:[%s4277_s2] ss:$0 sm:$0xff] }
  0xb6   :  { %v616_v5 = vadd.f32 %v615_v4, %v614_v47  ;;  %v446_v7 = vrot.slane %v445_v31, 1  ;;  %v653_v8 = vadd.f32 %v652_v3, %v651_v62  ;;  %vm1546_vm2 = vcmask 58368  }
  0xb7   :  { %2094 = vmatpush3.bf16.msra.mxu1 %v4304_v12  ;;  %v636_v29 = vadd.f32 %v635_v21, %v634_v52  ;;  %v431_v33 = vrot.slane %v430_v18, 2 }
  0xb8   :  { %2096 = vmatprep.subr.bf16.mxu1 %v2095_v41  ;;  %v957_v43 = vsel %vm944_vm1, %v616_v5, %v408_v16  ;;  %v447_v32 = vadd.f32 %v446_v7, %v445_v31  ;;  %v654_v60 = vrot.slane %v653_v8, 1 }
  0xb9   :  { %v637_v1 = vrot.slane %v636_v29, 4  ;;  %1462 = vmatmul.mubr.f32.vlgmr.msra.gmra.mrb[6].mxu0 %v957_v43  ;;  %v432_v37 = vadd.f32 %v431_v33, %v430_v18 }
  0xba   :  { %v655_v38 = vadd.f32 %v654_v60, %v653_v8 }
  0xbb   :  { %2098 = vmatpush3.bf16.msra.mxu1 %v2097_v61  ;;  %v638_v24 = vadd.f32 %v637_v1, %v636_v29  ;;  %v433_v34 = vrot.slane %v432_v37, 1 }
  0xbc   :  { %v960_v26 = vsel %vm944_vm1, %v655_v38, %v447_v32 }
  0xbd   :  { %v639_v63 = vrot.slane %v638_v24, 2  ;;  %1531 = vmatprep.mubr.f32.mxu1 %v960_v26  ;;  %v434_v10 = vadd.f32 %v433_v34, %v432_v37 }
  0xbf   :  { %v640_v44 = vadd.f32 %v639_v63, %v638_v24 }
  0xc1   :  { %v641_v22 = vrot.slane %v640_v44, 1 }
  0xc3   :  { %v642_v30 = vadd.f32 %v641_v22, %v640_v44 }
  0xc5   :  { %v959_v2 = vsel %vm944_vm1, %v642_v30, %v434_v10 }
  0xc6   :  { %1532 = vmatmul.mubr.f32.vlgmr.msra.gmra.mrb[6].mxu1 %v959_v2 }
 0x10c   :  { %v1595_v45 = vpop.f32.mrb[0].mxu0 }
 0x10d   :  { %v1596_v20 = vpop.f32.mrb[1].mxu0 }
 0x10e   :  { %v1597_v23 = vadd.f32 %v1596_v20, %v1595_v45 }
 0x115   :  { %v1630_v17 = vpop.f32.mrb[0].mxu1 }
 0x116   :  { %v1631_v27 = vpop.f32.mrb[1].mxu1 }
 0x117   :  { %v1632_v57 = vadd.f32 %v1631_v27, %v1630_v17 }
 0x119   :  { %v1114_v46 = vadd.f32 %v1632_v57, %v1597_v23 }
 0x134   :  { %v1665_v14 = vpop.f32.mrb[2].mxu0 }
 0x135   :  { %v1666_v36 = vpop.f32.mrb[3].mxu0 }
 0x136   :  { %v1667_v25 = vadd.f32 %v1666_v36, %v1665_v14 }
 0x138   :  { %v1184_v0 = vadd.f32 %v1667_v25, %v1114_v46 }
 0x141   :  { %v1700_v9 = vpop.f32.mrb[2].mxu1 }
 0x142   :  { %v1701_v28 = vpop.f32.mrb[3].mxu1 }
 0x143   :  { %v1702_v40 = vadd.f32 %v1701_v28, %v1700_v9 }
 0x145   :  { %v1254_v50 = vadd.f32 %v1702_v40, %v1184_v0 }
 0x15f   :  { %v1735_v51 = vpop.f32.mrb[4].mxu0 }
 0x160   :  { %v1736_v35 = vpop.f32.mrb[5].mxu0 }
 0x161   :  { %v1737_v53 = vadd.f32 %v1736_v35, %v1735_v51 }
 0x163   :  { %v1324_v19 = vadd.f32 %v1737_v53, %v1254_v50 }
 0x16b   :  { %v1770_v48 = vpop.f32.mrb[4].mxu1 }
 0x16c   :  { %v1771_v41 = vpop.f32.mrb[5].mxu1 }
 0x16d   :  { %v1772_v58 = vadd.f32 %v1771_v41, %v1770_v48 }
 0x16f   :  { %v1394_v55 = vadd.f32 %v1772_v58, %v1324_v19 }
 0x18c   :  { %v1805_v39 = vpop.f32.mrb[6].mxu0 }
 0x18d   :  { %v1806_v56 = vpop.f32.mrb[7].mxu0 }
 0x18e   :  { %v1807_v13 = vadd.f32 %v1806_v56, %v1805_v39 }
 0x190   :  { %v1464_v49 = vadd.f32 %v1807_v13, %v1394_v55 }
 0x199   :  { %v1840_v54 = vpop.f32.mrb[6].mxu1 }
 0x19a   :  { %v1841_v47 = vpop.f32.mrb[7].mxu1 }
 0x19b   :  { %v1842_v42 = vadd.f32 %v1841_v47, %v1840_v54 }
 0x19d   :  { %v1534_v62 = vadd.f32 %v1842_v42, %v1464_v49 }
 0x19f   :  { %v1537_v15 = vmul.f32 0.020408163, %v1534_v62 }
 0x1a1   :  { %v1545_v6 = vadd.f32 %v1562_v11, %v1537_v15 }
 0x1a3   :  { %1547 = vst.msk [vmem:[#allocation2] sm:$0x3] %vm1546_vm2, %v1545_v6 }
 0x1a4   :  { %2111 = shalt.err (!%p2108_p4)
}
 0x1a5   :  { %s2112_s5 = scalar_lea.hbm %s4278_s3, 32 }
 0x1a6   :  { %p2113_p5 = scmp.ne.s32.totalorder %s4278_s3, %s2112_s5  ;;  %p2116_p6 = scmp.lt.u32.totalorder %s2112_s5, %s4278_s3 }
 0x1a8   :  { %p2118_p7 = pnand %p2116_p6, %p2113_p5 }
 0x1aa   :  { %2121 = shalt.err (!%p2118_p7)
}
 0x1ab   :  { %1557 = dma.vmem_to_hbm [thread:$0]  %s1555_s28, 32, %s4278_s3, [#allocation3]  }
 0x1ac   :  { %2122 = dma.done.wait [#allocation3], 32  }
 0x1ad   :  { %2123 = vsyncadd [#allocation3], 4294967264 }
 0x1ae   :  { %1561 = vsyncpa [#allocation3], 1 }

</bundles_post_ra>
